<compile_context>
chip_gen: v7x
topology: tpu7x:2x2x1
jax: 0.10.0
libtpu: 0.0.40
codegen_flags: <defaults>
</compile_context>

<pallas_src>
import jax
import jax.numpy as jnp
from jax.experimental import pallas as pl
from jax.experimental.pallas import tpu as pltpu

LANE = 128
SUBLANE = 8
STRIP = 128          # lanes processed per inner-loop iteration
HIDDEN = 256


def _round_up(n, m):
    return ((n + m - 1) // m) * m


def _mlp_kernel(xt_ref, w1t_ref, w2t_ref, b2t_ref, ot_ref):
    """Transposed 2-layer MLP: ot = W2p^T @ relu(W1aug^T @ xt) + b2p.

    Shapes (batch on lanes):
      xt_ref : (KP, TB)      input^T with ones-row (bias fold), KP = 8
      w1t_ref: (H, KP)       [W1^T | b1 | 0...]
      w2t_ref: (AP, H)       W2^T zero-padded to AP = 8 sublanes
      b2t_ref: (AP, 1)
      ot_ref : (AP, TB)
    """
    n_strips = ot_ref.shape[1] // STRIP

    def strip(off):
        xs = xt_ref[:, pl.ds(off, STRIP)]                       # (KP, 128)
        ht = jnp.dot(w1t_ref[...], xs,
                     preferred_element_type=jnp.float32,
                     precision=jax.lax.Precision.HIGHEST)       # (H, 128)
        ht = jnp.maximum(ht, 0.0)
        ot_ref[:, pl.ds(off, STRIP)] = (
            jnp.dot(w2t_ref[...], ht,
                    preferred_element_type=jnp.float32,
                    precision=jax.lax.Precision.HIGHEST)
            + b2t_ref[...])                                     # (AP, 128)

    if n_strips == 1:
        strip(0)
    else:
        def body(s, carry):
            strip(pl.multiple_of(s * STRIP, STRIP))
            return carry
        jax.lax.fori_loop(0, n_strips, body, 0, unroll=False)


def prepare_params(w1, b1, w2, b2):
    """Pad/transpose parameters ONCE (hoisted off the per-call critical path).

    Args:
      w1: (obs_dim, 256), b1: (256,)/(1,256), w2: (256, n_actions),
      b2: (n_actions,)/(1, n_actions)   (PyTorch weights already transposed).
    Returns a tuple consumed by net_forward.
    """
    w1 = jnp.asarray(w1, jnp.float32)
    b1 = jnp.asarray(b1, jnp.float32).reshape(1, -1)
    w2 = jnp.asarray(w2, jnp.float32)
    b2 = jnp.asarray(b2, jnp.float32).reshape(1, -1)
    obs_dim, hidden = w1.shape
    n_actions = w2.shape[1]
    kp = _round_up(obs_dim + 1, SUBLANE)      # +1: ones-row folds b1 into W1
    ap = _round_up(n_actions, SUBLANE)

    w1t = jnp.zeros((hidden, kp), jnp.float32)
    w1t = w1t.at[:, :obs_dim].set(w1.T).at[:, obs_dim].set(b1[0])
    w2t = jnp.zeros((ap, hidden), jnp.float32).at[:n_actions, :].set(w2.T)
    b2t = jnp.zeros((ap, 1), jnp.float32).at[:n_actions, 0].set(b2[0])
    return (w1t, w2t, b2t, obs_dim, n_actions)


def net_forward(x, params, *, batch_tile=512):
    """Forward pass of the policy MLP. x: (B, obs_dim) f32 -> (B, n_actions)."""
    w1t, w2t, b2t, obs_dim, n_actions = params
    hidden, kp = w1t.shape
    ap = w2t.shape[0]
    batch = x.shape[0]

    small = batch <= batch_tile
    b_pad = _round_up(batch, STRIP if small else batch_tile)

    # Per-call input prep: transpose to lanes, append ones-row (bias fold),
    # zero-pad to KP sublanes / b_pad lanes. Tiny (8 * B floats).
    xt = jnp.zeros((kp, b_pad), jnp.float32)
    xt = xt.at[:obs_dim, :batch].set(x.T)
    xt = xt.at[obs_dim, :batch].set(1.0)

    if small:
        # Gridless acting path: whole problem VMEM-resident, no pipeline.
        ot = pl.pallas_call(
            _mlp_kernel,
            out_shape=jax.ShapeDtypeStruct((ap, b_pad), jnp.float32),
            in_specs=[pl.BlockSpec(memory_space=pltpu.MemorySpace.VMEM)] * 4,
            out_specs=pl.BlockSpec(memory_space=pltpu.MemorySpace.VMEM),
        )(xt, w1t, w2t, b2t)
    else:
        # Rollout path: parallel grid over batch lanes; weights stay resident
        # (constant index_map => no re-DMA across steps), x/out tiles stream.
        ot = pl.pallas_call(
            _mlp_kernel,
            out_shape=jax.ShapeDtypeStruct((ap, b_pad), jnp.float32),
            grid=(b_pad // batch_tile,),
            in_specs=[
                pl.BlockSpec((kp, batch_tile), lambda i: (0, i)),
                pl.BlockSpec((hidden, kp), lambda i: (0, 0)),
                pl.BlockSpec((ap, hidden), lambda i: (0, 0)),
                pl.BlockSpec((ap, 1), lambda i: (0, 0)),
            ],
            out_specs=pl.BlockSpec((ap, batch_tile), lambda i: (0, i)),
            compiler_params=pltpu.CompilerParams(
                dimension_semantics=("parallel",)),
        )(xt, w1t, w2t, b2t)

    # (AP, B_pad) -> (B, n_actions); only 8 sublanes of padded logits hit HBM.
    return ot[:n_actions, :batch].T


def init_params(key, obs_dim, n_actions, hidden=HIDDEN):
    """PyTorch nn.Linear-style init (uniform +/- 1/sqrt(fan_in))."""
    k1, k2, k3, k4 = jax.random.split(key, 4)
    lim1 = 1.0 / jnp.sqrt(jnp.float32(obs_dim))
    lim2 = 1.0 / jnp.sqrt(jnp.float32(hidden))
    w1 = jax.random.uniform(k1, (obs_dim, hidden), jnp.float32, -lim1, lim1)
    b1 = jax.random.uniform(k2, (1, hidden), jnp.float32, -lim1, lim1)
    w2 = jax.random.uniform(k3, (hidden, n_actions), jnp.float32, -lim2, lim2)
    b2 = jax.random.uniform(k4, (1, n_actions), jnp.float32, -lim2, lim2)
    return w1, b1, w2, b2


if __name__ == "__main__":
    # CartPole: obs_shape = (4,), n_actions = 2.
    obs_dim, n_actions = 4, 2

    key = jax.random.PRNGKey(0)
    kx, kw = jax.random.split(key)
    w1, b1, w2, b2 = init_params(kw, obs_dim, n_actions)
    params = prepare_params(w1, b1, w2, b2)   # pad/transpose once

    def ref_forward(x):
        with jax.default_matmul_precision("highest"):
            return jnp.maximum(x @ w1 + b1, 0.0) @ w2 + b2

    # Small-batch acting path (gridless, VMEM-resident).
    x_small = jax.random.normal(kx, (8, obs_dim), dtype=jnp.float32)
    out_s = jax.block_until_ready(net_forward(x_small, params))
    assert out_s.shape == (8, n_actions)
    assert jnp.allclose(out_s, ref_forward(x_small), atol=1e-4, rtol=1e-4)

    # Rollout path: 600 rows -> b_pad = 1024 -> 2 parallel grid steps
    # (keeps both v7x TensorCores busy; amortizes per-step overhead).
    x_big = jax.random.normal(kx, (600, obs_dim), dtype=jnp.float32)
    out_b = jax.block_until_ready(net_forward(x_big, params))
    assert out_b.shape == (600, n_actions)
    assert jnp.allclose(out_b, ref_forward(x_big), atol=1e-4, rtol=1e-4)

    print("KERNEL_OK")
</pallas_src>

<mosaic_0001>
module attributes {stable_mosaic.version = 11 : i64} {
  func.func @_mlp_kernel(%arg0: memref<8x128xf32, #tpu.memory_space<vmem>>, %arg1: memref<256x8xf32, #tpu.memory_space<vmem>>, %arg2: memref<8x256xf32, #tpu.memory_space<vmem>>, %arg3: memref<8x1xf32, #tpu.memory_space<vmem>>, %arg4: memref<8x128xf32, #tpu.memory_space<vmem>>) attributes {dimension_semantics = [], scalar_prefetch = 0 : i64, scratch_operands = 0 : i64, tpu.core_type = #tpu.core_type<tc>} {
    %c0 = arith.constant 0 : index
    %c0_0 = arith.constant 0 : index
    %0 = vector.load %arg0[%c0, %c0_0] : memref<8x128xf32, #tpu.memory_space<vmem>>, vector<8x128xf32>
    %c0_1 = arith.constant 0 : index
    %c0_2 = arith.constant 0 : index
    %1 = vector.load %arg1[%c0_1, %c0_2] : memref<256x8xf32, #tpu.memory_space<vmem>>, vector<256x8xf32>
    %cst = arith.constant dense<0.000000e+00> : vector<256x128xf32>
    %2 = tpu.matmul %1, %0, %cst {dimension_numbers = #tpu.dot_dimension_numbers<[1], [0], [0], [1], [0, 0, 1, 1], [], []>, precision = #tpu.contract_precision<fp32>} : vector<256x8xf32>, vector<8x128xf32>, vector<256x128xf32> -> vector<256x128xf32>
    %cst_3 = arith.constant 0.000000e+00 : f32
    %3 = vector.broadcast %cst_3 : f32 to vector<256x128xf32>
    %4 = arith.maximumf %2, %3 : vector<256x128xf32>
    %c0_4 = arith.constant 0 : index
    %c0_5 = arith.constant 0 : index
    %5 = vector.load %arg2[%c0_4, %c0_5] : memref<8x256xf32, #tpu.memory_space<vmem>>, vector<8x256xf32>
    %cst_6 = arith.constant dense<0.000000e+00> : vector<8x128xf32>
    %6 = tpu.matmul %5, %4, %cst_6 {dimension_numbers = #tpu.dot_dimension_numbers<[1], [0], [0], [1], [0, 0, 1, 1], [], []>, precision = #tpu.contract_precision<fp32>} : vector<8x256xf32>, vector<256x128xf32>, vector<8x128xf32> -> vector<8x128xf32>
    %c0_7 = arith.constant 0 : index
    %c0_8 = arith.constant 0 : index
    %7 = vector.load %arg3[%c0_7, %c0_8] : memref<8x1xf32, #tpu.memory_space<vmem>>, vector<8x1xf32>
    %8 = vector.broadcast %7 : vector<8x1xf32> to vector<8x128xf32>
    %9 = arith.addf %6, %8 : vector<8x128xf32>
    %c0_9 = arith.constant 0 : index
    %c0_10 = arith.constant 0 : index
    %10 = vector.load %arg4[%c0_9, %c0_10] : memref<8x128xf32, #tpu.memory_space<vmem>>, vector<8x128xf32>
    tpu.vector_store %arg4[%c0_9, %c0_10], %9 {strides = array<i32>} : memref<8x128xf32, #tpu.memory_space<vmem>>, vector<8x128xf32>,
    return
  }
}

</mosaic_0001>

<bundles_post_ra>
// kernel: tpu_custom_call.1
= control target key start
LH: loop header
LB: loop body
LE: loop exit
PB: predicated region body
PF: predicated region fallthrough
CT: control target
= control target key end

     0   :  { %vm51_vm0 = vcmask 64512   ;;  %s5200_s0 = inlined_call_operand.vmem [shape: f32[8,128], index: 0, kind: input, shape index: {}]   ;;  %s5201_s1 = inlined_call_operand.vmem [shape: f32[256,8], index: 1, kind: input, shape index: {}]   ;;  %s5202_s2 = inlined_call_operand.vmem [shape: f32[8,256], index: 2, kind: input, shape index: {}]   ;;  %s5203_s3 = inlined_call_operand.vmem [shape: f32[8,1], index: 3, kind: input, shape index: {}]   ;;  %s5204_s4 = inlined_call_operand.hbm [shape: f32[8,128], index: 4, kind: output, shape index: {}]  }
   0x1   :  { %v18_v0 = vld [vmem:[%s5200_s0] sm:$0xff]  ;;  %v20_v6 = vld [vmem:[%s5201_s1 + $0x8] sm:$0xff]  ;;  %v21_v7 = vld [vmem:[%s5201_s1 + $0x10] sm:$0xff] }
   0x2   :  { %v19_v1 = vld [vmem:[%s5201_s1] sm:$0xff]  ;;  %v3966_v2 = vand.u32 4294901760, %v18_v0  ;;  %v56_v9 = vsel %vm51_vm0, %v20_v6, 0  ;;  %v59_v11 = vsel %vm51_vm0, %v21_v7, 0  ;;  %v22_v12 = vld [vmem:[%s5201_s1 + $0x18] sm:$0xff]  ;;  %v24_v19 = vld [vmem:[%s5201_s1 + $0x28] sm:$0xff] }
   0x3   :  { %v53_v3 = vsel %vm51_vm0, %v19_v1, 0  ;;  %v23_v13 = vld [vmem:[%s5201_s1 + $0x20] sm:$0xff]  ;;  %v3994_v15 = vand.u32 4294901760, %v56_v9  ;;  %v3996_v16 = vand.u32 4294901760, %v59_v11  ;;  %v62_v17 = vsel %vm51_vm0, %v22_v12, 0  ;;  %v25_v20 = vld [vmem:[%s5201_s1 + $0x30] sm:$0xff] }
   0x4   :  { %v3969_v4 = vand.u32 4294901760, %v53_v3  ;;  %v536_v5 = vsub.f32 %v18_v0, %v3966_v2  ;;  %3252 = vmatprep.subr.mxu1 %v3966_v2  ;;  %v65_v18 = vsel %vm51_vm0, %v23_v13, 0  ;;  %v4010_v21 = vand.u32 4294901760, %v62_v17 }
   0x5   :  { %3253 = vmatpush3.msra.mxu1 %v3966_v2  ;;  %5323 = vst [vmem:[#allocation6_spill] sm:$0xff] %v3994_v15  ;;  %5324 = vst [vmem:[#allocation7_spill] sm:$0xff] %v3996_v16 }
   0x6   :  { %5322 = vst [vmem:[#allocation5_spill] sm:$0xff] %v3969_v4  ;;  %3304 = vmatprep.mubr.f32.mxu0 %v3969_v4  ;;  %v3981_v8 = vand.u32 4294901760, %v536_v5  ;;  %5325 = vst [vmem:[#allocation8_spill] sm:$0xff] %v4010_v21 }
   0x8   :  { %v538_v10 = vsub.f32 %v536_v5, %v3981_v8 }
   0xa   :  { %v3992_v14 = vand.u32 4294901760, %v538_v10 }
   0xc   :  { %3302 = vmatprep.subr.mxu0 %v3992_v14  ;;  %3744 = vmatprep.subr.mxu1 %v3992_v14 }
   0xd   :  { %3303 = vmatpush3.msra.mxu0 %v3992_v14 }
   0xe   :  { %3305 = vmatmul.mubr.f32.vlgmr.msra.gmra.mrb[0].mxu0 %v3994_v15  ;;  %3352 = vmatprep.subr.mxu0 %v536_v5 }
   0xf   :  { %9 = vsyncpa [#allocation3], 0  ;;  %3307 = vmatprep.mubr.f32.mxu0 %v3996_v16  ;;  %v4013_v22 = vand.u32 4294901760, %v65_v18  ;;  %v68_v23 = vsel %vm51_vm0, %v24_v19, 0  ;;  %3353 = vmatpush3.msra.mxu0 %v536_v5  ;;  %v71_v24 = vsel %vm51_vm0, %v25_v20, 0  ;;  %v26_v25 = vld [vmem:[%s5201_s1 + $0x38] sm:$0xff]  ;;  %v4047_v36 = vsub.f32 %v53_v3, %v3969_v4 }
  0x10   :  { %3402 = vmatprep.subr.mxu0 %v3966_v2  ;;  %v27_v26 = vld [vmem:[%s5201_s1 + $0x40] sm:$0xff]  ;;  %v4025_v27 = vand.u32 4294901760, %v68_v23  ;;  %v4028_v28 = vand.u32 4294901760, %v71_v24  ;;  %v74_v29 = vsel %vm51_vm0, %v26_v25, 0  ;;  %v28_v31 = vld [vmem:[%s5201_s1 + $0x48] sm:$0xff]  ;;  %v4050_v37 = vsub.f32 %v56_v9, %v3994_v15  ;;  %v29_v45 = vld [vmem:[%s5201_s1 + $0x50] sm:$0xff] }
  0x11   :  { %5326 = vst [vmem:[#allocation9_spill] sm:$0xff] %v4013_v22  ;;  %v77_v30 = vsel %vm51_vm0, %v27_v26, 0  ;;  %v4036_v32 = vand.u32 4294901760, %v74_v29  ;;  %v80_v34 = vsel %vm51_vm0, %v28_v31, 0  ;;  %v4053_v38 = vsub.f32 %v59_v11, %v3996_v16  ;;  %v30_v56 = vld [vmem:[%s5201_s1 + $0x58] sm:$0xff]  ;;  %v31_v60 = vld [vmem:[%s5201_s1 + $0x60] sm:$0xff] }
  0x12   :  { %3308 = vmatmul.mubr.f32.gmra.mrb[2].mxu0 %v4010_v21  ;;  %5327 = vst [vmem:[#allocation10_spill] sm:$0xff] %v4025_v27  ;;  %5328 = vst [vmem:[#allocation11_spill] sm:$0xff] %v4028_v28  ;;  %v4039_v33 = vand.u32 4294901760, %v77_v30  ;;  %v4043_v35 = vand.u32 4294901760, %v80_v34  ;;  %v4056_v39 = vsub.f32 %v62_v17, %v4010_v21  ;;  %v5223_v40 = vand.u32 4294901760, %v4047_v36  ;;  %v32_v6 = vld [vmem:[%s5201_s1 + $0x68] sm:$0xff] }
  0x13   :  { %3310 = vmatprep.mubr.f32.mxu0 %v4013_v22  ;;  %5329 = vst [vmem:[#allocation12_spill] sm:$0xff] %v4036_v32  ;;  %v5220_v41 = vand.u32 4294901760, %v4050_v37  ;;  %v4063_v42 = vsub.f32 %v65_v18, %v4013_v22  ;;  %v5219_v43 = vand.u32 4294901760, %v4053_v38  ;;  %v4077_v48 = vsub.f32 %v68_v23, %v4025_v27  ;;  %v33_v13 = vld [vmem:[%s5201_s1 + $0x70] sm:$0xff]  ;;  %v34_v25 = vld [vmem:[%s5201_s1 + $0x78] sm:$0xff] }
  0x14   :  { %5330 = vst [vmem:[#allocation13_spill] sm:$0xff] %v4039_v33  ;;  %5331 = vst [vmem:[#allocation14_spill] sm:$0xff] %v4043_v35  ;;  %v5218_v44 = vand.u32 4294901760, %v4056_v39  ;;  %v217_v46 = vsub.f32 %v4047_v36, %v5223_v40  ;;  %v4088_v52 = vsub.f32 %v71_v24, %v4028_v28  ;;  %v83_v55 = vsel %vm51_vm0, %v29_v45, 0  ;;  %v35_v45 = vld [vmem:[%s5201_s1 + $0x80] sm:$0xff] }
  0x15   :  { %v227_v47 = vsub.f32 %v4050_v37, %v5220_v41  ;;  %v5217_v49 = vand.u32 4294901760, %v4063_v42  ;;  %v237_v50 = vsub.f32 %v4053_v38, %v5219_v43  ;;  %v5215_v57 = vand.u32 4294901760, %v4077_v48 }
  0x16   :  { %3311 = vmatmul.mubr.f32.gmra.mrb[4].mxu0 %v4025_v27  ;;  %v247_v51 = vsub.f32 %v4056_v39, %v5218_v44  ;;  %v218_v53 = vand.u32 4294901760, %v217_v46  ;;  %v5213_v61 = vand.u32 4294901760, %v4088_v52  ;;  %v4106_v62 = vsub.f32 %v74_v29, %v4036_v32 }
  0x17   :  { %3313 = vmatprep.mubr.f32.mxu0 %v4028_v28  ;;  %v228_v54 = vand.u32 4294901760, %v227_v47  ;;  %v238_v58 = vand.u32 4294901760, %v237_v50  ;;  %v257_v59 = vsub.f32 %v4063_v42, %v5217_v49  ;;  %v4109_v63 = vsub.f32 %v77_v30, %v4039_v33 }
  0x18   :  { %3254 = vmatprep.mubr.f32.mxu1 %v218_v53  ;;  %v248_v0 = vand.u32 4294901760, %v247_v51  ;;  %v267_v1 = vsub.f32 %v4077_v48, %v5215_v57  ;;  %v4115_v3 = vand.u32 4294901760, %v83_v55  ;;  %v86_v5 = vsel %vm51_vm0, %v30_v56, 0  ;;  %v36_v51 = vld [vmem:[%s5201_s1 + $0x88] sm:$0xff] }
  0x19   :  { %3255 = vmatmul.mubr.f32.vlgmr.msra.gmra.mrb[0].mxu1 %v228_v54  ;;  %v258_v7 = vand.u32 4294901760, %v257_v59  ;;  %v277_v9 = vsub.f32 %v4088_v52, %v5213_v61  ;;  %v89_v10 = vsel %vm51_vm0, %v31_v60, 0  ;;  %v5211_v11 = vand.u32 4294901760, %v4106_v62  ;;  %v42_v61 = vld [vmem:[%s5201_s1 + $0xb8] sm:$0xff] }
  0x1a   :  { %3314 = vmatmul.mubr.f32.gmra.mrb[6].mxu0 %v4036_v32  ;;  %3257 = vmatprep.mubr.f32.mxu1 %v238_v58  ;;  %v4129_v12 = vsub.f32 %v80_v34, %v4043_v35  ;;  %v5210_v17 = vand.u32 4294901760, %v4109_v63  ;;  %v4135_v18 = vand.u32 4294901760, %v86_v5  ;;  %v92_v19 = vsel %vm51_vm0, %v32_v6, 0 }
  0x1b   :  { %3316 = vmatprep.mubr.f32.mxu0 %v4039_v33  ;;  %3745 = vmatpush3.msra.mxu1 %v3992_v14  ;;  %v268_v20 = vand.u32 4294901760, %v267_v1  ;;  %v287_v23 = vsub.f32 %v4106_v62, %v5211_v11  ;;  %v4143_v14 = vsub.f32 %v83_v55, %v4115_v3  ;;  %v4145_v24 = vand.u32 4294901760, %v89_v10 }
  0x1c   :  { %v278_v26 = vand.u32 4294901760, %v277_v9  ;;  %v297_v29 = vsub.f32 %v4109_v63, %v5210_v17  ;;  %v95_v30 = vsel %vm51_vm0, %v33_v13, 0  ;;  %v5209_v31 = vand.u32 4294901760, %v4129_v12 }
  0x1d   :  { %3258 = vmatmul.mubr.f32.gmra.mrb[2].mxu1 %v248_v0  ;;  %v4156_v34 = vand.u32 4294901760, %v92_v19  ;;  %v5208_v46 = vand.u32 4294901760, %v4143_v14  ;;  %v4163_v47 = vsub.f32 %v86_v5, %v4135_v18  ;;  %v98_v50 = vsel %vm51_vm0, %v34_v25, 0  ;;  %v37_v5 = vld [vmem:[%s5201_s1 + $0x90] sm:$0xff] }
  0x1e   :  { %3317 = vmatmul.mubr.f32.gmra.mrb[8].mxu0 %v4043_v35  ;;  %3260 = vmatprep.mubr.f32.mxu1 %v258_v7  ;;  %v288_v53 = vand.u32 4294901760, %v287_v23  ;;  %v307_v54 = vsub.f32 %v4129_v12, %v5209_v31  ;;  %v4174_v55 = vsub.f32 %v89_v10, %v4145_v24  ;;  %v4176_v56 = vand.u32 4294901760, %v95_v30  ;;  %v46_v35 = vld [vmem:[%s5201_s1 + $0xd8] sm:$0xff] }
  0x1f   :  { %3354 = vmatprep.mubr.f32.mxu0 %v4047_v36  ;;  %v298_v58 = vand.u32 4294901760, %v297_v29  ;;  %v317_v59 = vsub.f32 %v4143_v14, %v5208_v46  ;;  %v101_v60 = vsel %vm51_vm0, %v35_v45, 0  ;;  %v5206_v0 = vand.u32 4294901760, %v4163_v47 }
  0x20   :  { %v104_v1 = vsel %vm51_vm0, %v36_v51, 0  ;;  %v5205_v6 = vand.u32 4294901760, %v4174_v55  ;;  %v4190_v7 = vsub.f32 %v92_v19, %v4156_v34  ;;  %v4192_v9 = vand.u32 4294901760, %v98_v50  ;;  %v38_v19 = vld [vmem:[%s5201_s1 + $0x98] sm:$0xff]  ;;  %v39_v51 = vld [vmem:[%s5201_s1 + $0xa0] sm:$0xff] }
  0x21   :  { %3261 = vmatmul.mubr.f32.gmra.mrb[4].mxu1 %v268_v20  ;;  %v308_v10 = vand.u32 4294901760, %v307_v54  ;;  %v327_v13 = vsub.f32 %v4163_v47, %v5206_v0  ;;  %v4199_v20 = vsub.f32 %v95_v30, %v4176_v56  ;;  %v4201_v23 = vand.u32 4294901760, %v101_v60 }
  0x22   :  { %3355 = vmatmul.mubr.f32.vlgmr.msra.gmra.mrb[0].mxu0 %v4050_v37  ;;  %3263 = vmatprep.mubr.f32.mxu1 %v278_v26  ;;  %v318_v25 = vand.u32 4294901760, %v317_v59  ;;  %v337_v26 = vsub.f32 %v4174_v55, %v5205_v6  ;;  %v107_v29 = vsel %vm51_vm0, %v37_v5, 0  ;;  %v5207_v45 = vand.u32 4294901760, %v4190_v7 }
  0x23   :  { %3357 = vmatprep.mubr.f32.mxu0 %v4053_v38  ;;  %3403 = vmatpush3.msra.mxu0 %v3966_v2  ;;  %v4212_v30 = vand.u32 4294901760, %v104_v1  ;;  %v4219_v54 = vsub.f32 %v98_v50, %v4192_v9  ;;  %v328_v59 = vand.u32 4294901760, %v327_v13  ;;  %v4227_v6 = vsub.f32 %v101_v60, %v4201_v23  ;;  %v40_v50 = vld [vmem:[%s5201_s1 + $0xa8] sm:$0xff] }
  0x24   :  { %3452 = vmatprep.subr.mxu0 %v3981_v8  ;;  %v347_v5 = vsub.f32 %v4190_v7, %v5207_v45  ;;  %v4229_v0 = vand.u32 4294901760, %v107_v29  ;;  %v338_v13 = vand.u32 4294901760, %v337_v26  ;;  %v113_v60 = vsel %vm51_vm0, %v39_v51, 0 }
  0x25   :  { %3264 = vmatmul.mubr.f32.gmra.mrb[6].mxu1 %v288_v53  ;;  %v5212_v53 = vand.u32 4294901760, %v4199_v20  ;;  %v5214_v45 = vand.u32 4294901760, %v4219_v54  ;;  %v4244_v46 = vsub.f32 %v104_v1, %v4212_v30  ;;  %v5216_v17 = vand.u32 4294901760, %v4227_v6 }
  0x26   :  { %3358 = vmatmul.mubr.f32.gmra.mrb[2].mxu0 %v4056_v39  ;;  %3266 = vmatprep.mubr.f32.mxu1 %v298_v58  ;;  %v110_v58 = vsel %vm51_vm0, %v38_v19, 0  ;;  %v348_v11 = vand.u32 4294901760, %v347_v5  ;;  %v4256_v51 = vsub.f32 %v107_v29, %v4229_v0  ;;  %v4258_v1 = vand.u32 4294901760, %v113_v60  ;;  %v43_v5 = vld [vmem:[%s5201_s1 + $0xc0] sm:$0xff] }
  0x27   :  { %3360 = vmatprep.mubr.f32.mxu0 %v4063_v42  ;;  %v357_v19 = vsub.f32 %v4199_v20, %v5212_v53  ;;  %v4246_v31 = vand.u32 4294901760, %v110_v58  ;;  %v367_v53 = vsub.f32 %v4219_v54, %v5214_v45  ;;  %v5221_v29 = vand.u32 4294901760, %v4244_v46 }
  0x28   :  { %v5222_v57 = vand.u32 4294901760, %v4256_v51  ;;  %v4285_v44 = vsub.f32 %v113_v60, %v4258_v1  ;;  %v125_v43 = vsel %vm51_vm0, %v43_v5, 0  ;;  %v45_v5 = vld [vmem:[%s5201_s1 + $0xd0] sm:$0xff] }
  0x29   :  { %3267 = vmatmul.mubr.f32.gmra.mrb[8].mxu1 %v308_v10  ;;  %v41_v10 = vld [vmem:[%s5201_s1 + $0xb0] sm:$0xff]  ;;  %v387_v49 = vsub.f32 %v4244_v46, %v5221_v29 }
  0x2a   :  { %3361 = vmatmul.mubr.f32.gmra.mrb[4].mxu0 %v4077_v48  ;;  %3269 = vmatprep.mubr.f32.mxu1 %v318_v25  ;;  %v116_v25 = vsel %vm51_vm0, %v40_v50, 0  ;;  %v119_v26 = vsel %vm51_vm0, %v41_v10, 0  ;;  %v358_v50 = vand.u32 4294901760, %v357_v19  ;;  %v122_v19 = vsel %vm51_vm0, %v42_v61, 0  ;;  %5332 = vst [vmem:[#allocation15_spill] sm:$0xff] %v4285_v44 }
  0x2b   :  { %3363 = vmatprep.mubr.f32.mxu0 %v4088_v52  ;;  %v4271_v10 = vand.u32 4294901760, %v116_v25  ;;  %v4273_v45 = vand.u32 4294901760, %v119_v26  ;;  %v397_v61 = vsub.f32 %v4256_v51, %v5222_v57  ;;  %v4299_v60 = vand.u32 4294901760, %v122_v19 }
  0x2c   :  { %v388_v57 = vand.u32 4294901760, %v387_v49  ;;  %v5335_v33 = vand.u32 4294901760, %v4285_v44  ;;  %v131_v49 = vsel %vm51_vm0, %v45_v5, 0 }
  0x2d   :  { %3270 = vmatmul.mubr.f32.gmra.mrb[10].mxu1 %v328_v59  ;;  %v377_v59 = vsub.f32 %v4227_v6, %v5216_v17  ;;  %v368_v17 = vand.u32 4294901760, %v367_v53  ;;  %v4297_v53 = vsub.f32 %v116_v25, %v4271_v10  ;;  %v4313_v25 = vsub.f32 %v119_v26, %v4273_v45 }
  0x2e   :  { %3364 = vmatmul.mubr.f32.gmra.mrb[6].mxu0 %v4106_v62  ;;  %3272 = vmatprep.mubr.f32.mxu1 %v338_v13  ;;  %v4277_v13 = vsub.f32 %v110_v58, %v4246_v31  ;;  %v44_v58 = vld [vmem:[%s5201_s1 + $0xc8] sm:$0xff]  ;;  %v4341_v27 = vand.u32 4294901760, %v131_v49 }
  0x2f   :  { %3366 = vmatprep.mubr.f32.mxu0 %v4109_v63  ;;  %v378_v41 = vand.u32 4294901760, %v377_v59  ;;  %5333 = vst [vmem:[#allocation16_spill] sm:$0xff] %v4297_v53  ;;  %v4305_v59 = vand.u32 4294901760, %v125_v43  ;;  %v128_v29 = vsel %vm51_vm0, %v44_v58, 0  ;;  %5334 = vst [vmem:[#allocation17_spill] sm:$0xff] %v4313_v25  ;;  %v47_v58 = vld [vmem:[%s5201_s1 + $0xe0] sm:$0xff] }
  0x30   :  { %v5235_v26 = vand.u32 4294901760, %v4297_v53  ;;  %v4330_v32 = vand.u32 4294901760, %v128_v29  ;;  %v4369_v15 = vsub.f32 %v131_v49, %v4341_v27 }
  0x31   :  { %3273 = vmatmul.mubr.f32.gmra.mrb[12].mxu1 %v348_v11  ;;  %v5228_v11 = vand.u32 4294901760, %v4277_v13 }
  0x32   :  { %3367 = vmatmul.mubr.f32.gmra.mrb[8].mxu0 %v4129_v12  ;;  %3275 = vmatprep.mubr.f32.mxu1 %v358_v50  ;;  %v398_v50 = vand.u32 4294901760, %v397_v61  ;;  %v4334_v61 = vsub.f32 %v125_v43, %v4305_v59  ;;  %v427_v28 = vsub.f32 %v4297_v53, %v5235_v26  ;;  %v5253_v49 = vand.u32 4294901760, %v4369_v15 }
  0x33   :  { %3369 = vmatprep.mubr.f32.mxu0 %v4143_v14  ;;  %v407_v40 = vsub.f32 %v4277_v13, %v5228_v11  ;;  %v4328_v11 = vsub.f32 %v122_v19, %v4299_v60  ;;  %v137_v19 = vsel %vm51_vm0, %v47_v58, 0  ;;  %v4356_v58 = vsub.f32 %v128_v29, %v4330_v32 }
  0x35   :  { %3276 = vmatmul.mubr.f32.gmra.mrb[14].mxu1 %v368_v17  ;;  %v417_v17 = vsub.f32 %v4285_v44, %v5335_v33  ;;  %5336 = vst [vmem:[#allocation18_spill] sm:$0xff] %v4328_v11  ;;  %v134_v33 = vsel %vm51_vm0, %v46_v35, 0  ;;  %v408_v5 = vand.u32 4294901760, %v407_v40  ;;  %v5337_v35 = vand.u32 4294901760, %v4313_v25 }
  0x36   :  { %3370 = vmatmul.mubr.f32.gmra.mrb[10].mxu0 %v4163_v47  ;;  %3278 = vmatprep.mubr.f32.mxu1 %v378_v41  ;;  %v48_v41 = vld [vmem:[%s5201_s1 + $0xe8] sm:$0xff]  ;;  %v5248_v26 = vand.u32 4294901760, %v4328_v11  ;;  %v4358_v22 = vand.u32 4294901760, %v134_v33 }
  0x37   :  { %3372 = vmatprep.mubr.f32.mxu0 %v4174_v55  ;;  %v418_v43 = vand.u32 4294901760, %v417_v17  ;;  %v437_v40 = vsub.f32 %v4313_v25, %v5337_v35  ;;  %v4361_v17 = vand.u32 4294901760, %v137_v19  ;;  %v140_v21 = vsel %vm51_vm0, %v48_v41, 0 }
  0x38   :  { %v428_v35 = vand.u32 4294901760, %v427_v28  ;;  %v447_v16 = vsub.f32 %v4328_v11, %v5248_v26  ;;  %v50_v28 = vld [vmem:[%s5201_s1 + $0xf8] sm:$0xff]  ;;  %v5251_v41 = vand.u32 4294901760, %v4356_v58 }
  0x39   :  { %3279 = vmatmul.mubr.f32.gmra.mrb[16].mxu1 %v388_v57  ;;  %v49_v57 = vld [vmem:[%s5201_s1 + $0xf0] sm:$0xff]  ;;  %v438_v4 = vand.u32 4294901760, %v437_v40  ;;  %v4393_v26 = vsub.f32 %v137_v19, %v4361_v17 }
  0x3a   :  { %3373 = vmatmul.mubr.f32.gmra.mrb[12].mxu0 %v4190_v7  ;;  %3281 = vmatprep.mubr.f32.mxu1 %v398_v50  ;;  %v5247_v50 = vand.u32 4294901760, %v4334_v61  ;;  %v143_v29 = vsel %vm51_vm0, %v49_v57, 0  ;;  %v4384_v57 = vand.u32 4294901760, %v140_v21  ;;  %v448_v40 = vand.u32 4294901760, %v447_v16 }
  0x3b   :  { %3375 = vmatprep.mubr.f32.mxu0 %v4199_v20 }
  0x3d   :  { %3282 = vmatmul.mubr.f32.gmra.mrb[18].mxu1 %v408_v5  ;;  %v4381_v5 = vsub.f32 %v134_v33, %v4358_v22  ;;  %v146_v33 = vsel %vm51_vm0, %v50_v28, 0 }
  0x3e   :  { %3376 = vmatmul.mubr.f32.gmra.mrb[14].mxu0 %v4219_v54  ;;  %3284 = vmatprep.mubr.f32.mxu1 %v418_v43  ;;  %v4386_v43 = vand.u32 4294901760, %v143_v29 }
  0x3f   :  { %3378 = vmatprep.mubr.f32.mxu0 %v4227_v6  ;;  %v5254_v16 = vand.u32 4294901760, %v4381_v5 }
  0x41   :  { %3285 = vmatmul.mubr.f32.gmra.mrb[20].mxu1 %v428_v35  ;;  %v5255_v35 = vand.u32 4294901760, %v4393_v26 }
  0x42   :  { %3379 = vmatmul.mubr.f32.gmra.mrb[16].mxu0 %v4244_v46  ;;  %3287 = vmatprep.mubr.f32.mxu1 %v438_v4  ;;  %v487_v4 = vsub.f32 %v4381_v5, %v5254_v16 }
  0x43   :  { %3381 = vmatprep.mubr.f32.mxu0 %v4256_v51 }
  0x44   :  { %v488_v16 = vand.u32 4294901760, %v487_v4 }
  0x45   :  { %3288 = vmatmul.mubr.f32.gmra.mrb[22].mxu1 %v448_v40 }
  0x46   :  { %3382 = vmatmul.mubr.f32.gmra.mrb[18].mxu0 %v4277_v13 }
  0x47   :  { %3384 = vmatprep.mubr.f32.mxu0 %v4285_v44  ;;  %v457_v44 = vsub.f32 %v4334_v61, %v5247_v50  ;;  %v467_v50 = vsub.f32 %v4356_v58, %v5251_v41  ;;  %v4403_v41 = vsub.f32 %v140_v21, %v4384_v57  ;;  %v497_v21 = vsub.f32 %v4393_v26, %v5255_v35 }
  0x49   :  { %v468_v19 = vand.u32 4294901760, %v467_v50  ;;  %v506_v40 = vand.u32 4294901760, %v4403_v41 }
  0x4a   :  { %3385 = vmatmul.mubr.f32.gmra.mrb[20].mxu0 %v4297_v53  ;;  %v477_v53 = vsub.f32 %v4369_v15, %v5253_v49 }
  0x4b   :  { %3387 = vmatprep.mubr.f32.mxu0 %v4313_v25  ;;  %v458_v25 = vand.u32 4294901760, %v457_v44  ;;  %v4412_v44 = vsub.f32 %v143_v29, %v4386_v43 }
  0x4c   :  { %v478_v28 = vand.u32 4294901760, %v477_v53  ;;  %v498_v53 = vand.u32 4294901760, %v497_v21  ;;  %v5338_v21 = vand.u32 4294901760, %v4047_v36  ;;  %v5342_v36 = vand.u32 4294901760, %v4063_v42 }
  0x4d   :  { %3290 = vmatprep.mubr.f32.mxu1 %v458_v25  ;;  %v516_v50 = vand.u32 4294901760, %v4412_v44  ;;  %v507_v25 = vsub.f32 %v4403_v41, %v506_v40  ;;  %v5347_v42 = vand.u32 4294901760, %v4129_v12  ;;  %v5352_v12 = vand.u32 4294901760, %v4199_v20 }
  0x4e   :  { %3388 = vmatmul.mubr.f32.gmra.mrb[22].mxu0 %v4328_v11  ;;  %v4405_v11 = vand.u32 4294901760, %v146_v33  ;;  %3291 = vmatmul.mubr.f32.gmra.mrb[24].mxu1 %v468_v19  ;;  %v5357_v20 = vand.u32 4294901760, %v4277_v13 }
  0x4f   :  { %3390 = vmatprep.mubr.f32.mxu0 %v4334_v61  ;;  %3293 = vmatprep.mubr.f32.mxu1 %v478_v28  ;;  %v517_v29 = vsub.f32 %v4412_v44, %v516_v50 }
  0x50   :  { %v4421_v49 = vsub.f32 %v146_v33, %v4405_v11  ;;  %v508_v33 = vand.u32 4294901760, %v507_v25  ;;  %v5340_v25 = vand.u32 4294901760, %v4053_v38  ;;  %v5345_v38 = vand.u32 4294901760, %v4106_v62 }
  0x51   :  { %v518_v4 = vand.u32 4294901760, %v517_v29  ;;  %v5350_v62 = vand.u32 4294901760, %v4174_v55  ;;  %v5355_v55 = vand.u32 4294901760, %v4244_v46  ;;  %v5360_v29 = vld [vmem:[#allocation16_spill] sm:$0xff] }
  0x52   :  { %3391 = vmatmul.mubr.f32.gmra.mrb[24].mxu0 %v4356_v58  ;;  %v526_v35 = vand.u32 4294901760, %v4421_v49  ;;  %3294 = vmatmul.mubr.f32.gmra.mrb[26].mxu1 %v488_v16  ;;  %v5339_v16 = vand.u32 4294901760, %v4050_v37  ;;  %v5343_v37 = vand.u32 4294901760, %v4077_v48  ;;  %v5348_v48 = vand.u32 4294901760, %v4143_v14 }
  0x53   :  { %3393 = vmatprep.mubr.f32.mxu0 %v4369_v15  ;;  %3296 = vmatprep.mubr.f32.mxu1 %v498_v53  ;;  %v5341_v53 = vand.u32 4294901760, %v4056_v39  ;;  %v5346_v39 = vand.u32 4294901760, %v4109_v63  ;;  %v5351_v63 = vand.u32 4294901760, %v4190_v7  ;;  %v5353_v14 = vand.u32 4294901760, %v4219_v54  ;;  %v5358_v54 = vld [vmem:[#allocation15_spill] sm:$0xff] }
  0x54   :  { %v527_v19 = vsub.f32 %v4421_v49, %v526_v35  ;;  %v5356_v7 = vand.u32 4294901760, %v4256_v51  ;;  %v5361_v46 = vand.u32 4294901760, %v5360_v29 }
  0x56   :  { %3394 = vmatmul.mubr.f32.gmra.mrb[26].mxu0 %v4381_v5  ;;  %3297 = vmatmul.mubr.f32.gmra.mrb[28].mxu1 %v508_v33  ;;  %v528_v28 = vand.u32 4294901760, %v527_v19  ;;  %v5362_v33 = vld [vmem:[#allocation17_spill] sm:$0xff]  ;;  %v5364_v19 = vld [vmem:[#allocation18_spill] sm:$0xff] }
  0x57   :  { %3396 = vmatprep.mubr.f32.mxu0 %v4393_v26  ;;  %3299 = vmatprep.mubr.f32.mxu1 %v518_v4  ;;  %v5363_v51 = vand.u32 4294901760, %v5362_v33  ;;  %v5365_v13 = vand.u32 4294901760, %v5364_v19  ;;  %v5366_v4 = vand.u32 4294901760, %v4334_v61  ;;  %v5371_v61 = vld [vmem:[#allocation5_spill] sm:$0xff] }
  0x5a   :  { %3397 = vmatmul.mubr.f32.gmra.mrb[28].mxu0 %v4403_v41  ;;  %3300 = vmatmul.mubr.f32.gmra.mrb[30].mxu1 %v528_v28  ;;  %v5367_v28 = vand.u32 4294901760, %v4356_v58  ;;  %v5372_v58 = vld [vmem:[#allocation6_spill] sm:$0xff] }
  0x5b   :  { %3399 = vmatprep.mubr.f32.mxu0 %v4412_v44  ;;  %3319 = vmatprep.mubr.f32.mxu1 %v4115_v3  ;;  %v5376_v41 = vld [vmem:[#allocation10_spill] sm:$0xff]  ;;  %v5378_v44 = vld [vmem:[#allocation12_spill] sm:$0xff] }
  0x5e   :  { %3400 = vmatmul.mubr.f32.gmra.mrb[30].mxu0 %v4421_v49  ;;  %3320 = vmatmul.mubr.f32.vlgmr.msra.gmra.mrb[10].mxu1 %v4135_v18  ;;  %v5379_v49 = vld [vmem:[#allocation13_spill] sm:$0xff] }
  0x5f   :  { %3404 = vmatprep.mubr.f32.mxu0 %v5338_v21  ;;  %3322 = vmatprep.mubr.f32.mxu1 %v4145_v24  ;;  %v5368_v21 = vand.u32 4294901760, %v4369_v15  ;;  %v5373_v15 = vld [vmem:[#allocation7_spill] sm:$0xff] }
  0x62   :  { %3405 = vmatmul.mubr.f32.vlgmr.msra.gmra.mrb[0].mxu0 %v5339_v16  ;;  %3323 = vmatmul.mubr.f32.gmra.mrb[12].mxu1 %v4156_v34  ;;  %v5369_v16 = vand.u32 4294901760, %v4381_v5  ;;  %v5374_v5 = vld [vmem:[#allocation8_spill] sm:$0xff] }
  0x63   :  { %3407 = vmatprep.mubr.f32.mxu0 %v5340_v25  ;;  %3453 = vmatpush3.msra.mxu0 %v3981_v8  ;;  %v5344_v8 = vand.u32 4294901760, %v4088_v52  ;;  %v5349_v52 = vand.u32 4294901760, %v4163_v47  ;;  %v5354_v47 = vand.u32 4294901760, %v4227_v6  ;;  %v5359_v6 = vand.u32 4294901760, %v5358_v54 }
  0x64   :  { %3502 = vmatprep.subr.mxu0 %v3966_v2  ;;  %3325 = vmatprep.mubr.f32.mxu1 %v4176_v56  ;;  %v5370_v25 = vand.u32 4294901760, %v4393_v26  ;;  %v5375_v26 = vld [vmem:[#allocation9_spill] sm:$0xff] }
  0x66   :  { %3408 = vmatmul.mubr.f32.gmra.mrb[2].mxu0 %v5341_v53  ;;  %3326 = vmatmul.mubr.f32.gmra.mrb[14].mxu1 %v4192_v9 }
  0x67   :  { %3410 = vmatprep.mubr.f32.mxu0 %v5342_v36  ;;  %3328 = vmatprep.mubr.f32.mxu1 %v4201_v23 }
  0x6a   :  { %3411 = vmatmul.mubr.f32.gmra.mrb[4].mxu0 %v5343_v37  ;;  %3329 = vmatmul.mubr.f32.gmra.mrb[16].mxu1 %v4212_v30 }
  0x6b   :  { %3413 = vmatprep.mubr.f32.mxu0 %v5344_v8  ;;  %3331 = vmatprep.mubr.f32.mxu1 %v4229_v0 }
  0x6e   :  { %3414 = vmatmul.mubr.f32.gmra.mrb[6].mxu0 %v5345_v38  ;;  %3332 = vmatmul.mubr.f32.gmra.mrb[18].mxu1 %v4246_v31 }
  0x6f   :  { %3416 = vmatprep.mubr.f32.mxu0 %v5346_v39  ;;  %3334 = vmatprep.mubr.f32.mxu1 %v4258_v1 }
  0x72   :  { %3417 = vmatmul.mubr.f32.gmra.mrb[8].mxu0 %v5347_v42  ;;  %3335 = vmatmul.mubr.f32.gmra.mrb[20].mxu1 %v4271_v10 }
  0x73   :  { %3419 = vmatprep.mubr.f32.mxu0 %v5348_v48  ;;  %3337 = vmatprep.mubr.f32.mxu1 %v4273_v45 }
  0x76   :  { %3420 = vmatmul.mubr.f32.gmra.mrb[10].mxu0 %v5349_v52  ;;  %3338 = vmatmul.mubr.f32.gmra.mrb[22].mxu1 %v4299_v60  ;;  %v1960_v52 = vld [vmem:[%s5202_s2 + $0x8] sm:$0xff] }
  0x77   :  { %3422 = vmatprep.mubr.f32.mxu0 %v5350_v62  ;;  %3340 = vmatprep.mubr.f32.mxu1 %v4305_v59  ;;  %v4656_v62 = vand.u32 4294901760, %v1960_v52 }
  0x79   :  { %5381 = vst [vmem:[#allocation15_spill] sm:$0xff] %v4656_v62 }
  0x7a   :  { %3423 = vmatmul.mubr.f32.gmra.mrb[12].mxu0 %v5351_v63  ;;  %3341 = vmatmul.mubr.f32.gmra.mrb[24].mxu1 %v4330_v32  ;;  %v4659_v63 = vsub.f32 %v1960_v52, %v4656_v62 }
  0x7b   :  { %3425 = vmatprep.mubr.f32.mxu0 %v5352_v12  ;;  %3343 = vmatprep.mubr.f32.mxu1 %v4341_v27 }
  0x7c   :  { %5382 = vst [vmem:[#allocation16_spill] sm:$0xff] %v4659_v63  ;;  %v5257_v12 = vand.u32 4294901760, %v4659_v63 }
  0x7e   :  { %3426 = vmatmul.mubr.f32.gmra.mrb[14].mxu0 %v5353_v14  ;;  %3344 = vmatmul.mubr.f32.gmra.mrb[26].mxu1 %v4358_v22  ;;  %v2066_v14 = vsub.f32 %v4659_v63, %v5257_v12 }
  0x7f   :  { %3428 = vmatprep.mubr.f32.mxu0 %v5354_v47  ;;  %3346 = vmatprep.mubr.f32.mxu1 %v4361_v17 }
  0x80   :  { %v2067_v47 = vand.u32 4294901760, %v2066_v14 }
  0x82   :  { %3429 = vmatmul.mubr.f32.gmra.mrb[16].mxu0 %v5355_v55  ;;  %3347 = vmatmul.mubr.f32.gmra.mrb[28].mxu1 %v4384_v57  ;;  %v1959_v55 = vld [vmem:[%s5202_s2] sm:$0xff] }
  0x83   :  { %3431 = vmatprep.mubr.f32.mxu0 %v5356_v7  ;;  %3349 = vmatprep.mubr.f32.mxu1 %v4386_v43  ;;  %v4668_v7 = vand.u32 4294901760, %v1959_v55 }
  0x85   :  { %5383 = vst [vmem:[#allocation17_spill] sm:$0xff] %v4668_v7 }
  0x86   :  { %3432 = vmatmul.mubr.f32.gmra.mrb[18].mxu0 %v5357_v20  ;;  %3350 = vmatmul.mubr.f32.gmra.mrb[30].mxu1 %v4405_v11  ;;  %v4671_v20 = vsub.f32 %v1959_v55, %v4668_v7 }
  0x87   :  { %3434 = vmatprep.mubr.f32.mxu0 %v5359_v6  ;;  %2068 = vmatprep.mubr.f32.mxu1 %v2067_v47 }
  0x88   :  { %5384 = vst [vmem:[#allocation18_spill] sm:$0xff] %v4671_v20 }
  0x8a   :  { %3435 = vmatmul.mubr.f32.gmra.mrb[20].mxu0 %v5361_v46 }
  0x8b   :  { %3437 = vmatprep.mubr.f32.mxu0 %v5363_v51  ;;  %v5256_v51 = vand.u32 4294901760, %v4671_v20 }
  0x8e   :  { %3438 = vmatmul.mubr.f32.gmra.mrb[22].mxu0 %v5365_v13 }
  0x8f   :  { %3440 = vmatprep.mubr.f32.mxu0 %v5366_v4 }
  0x92   :  { %3441 = vmatmul.mubr.f32.gmra.mrb[24].mxu0 %v5367_v28 }
  0x93   :  { %3443 = vmatprep.mubr.f32.mxu0 %v5368_v21 }
  0x96   :  { %3444 = vmatmul.mubr.f32.gmra.mrb[26].mxu0 %v5369_v16 }
  0x97   :  { %3446 = vmatprep.mubr.f32.mxu0 %v5370_v25 }
  0x9a   :  { %3447 = vmatmul.mubr.f32.gmra.mrb[28].mxu0 %v506_v40  ;;  %v5377_v40 = vld [vmem:[#allocation11_spill] sm:$0xff] }
  0x9b   :  { %3449 = vmatprep.mubr.f32.mxu0 %v516_v50 }
  0x9e   :  { %3450 = vmatmul.mubr.f32.gmra.mrb[30].mxu0 %v526_v35  ;;  %v5380_v35 = vld [vmem:[#allocation14_spill] sm:$0xff] }
  0x9f   :  { %3454 = vmatprep.mubr.f32.mxu0 %v5371_v61 }
  0xa2   :  { %3455 = vmatmul.mubr.f32.vlgmr.msra.gmra.mrb[0].mxu0 %v5372_v58 }
  0xa3   :  { %3457 = vmatprep.mubr.f32.mxu0 %v5373_v15  ;;  %3503 = vmatpush3.msra.mxu0 %v3966_v2 }
  0xa6   :  { %3458 = vmatmul.mubr.f32.gmra.mrb[2].mxu0 %v5374_v5 }
  0xa7   :  { %3460 = vmatprep.mubr.f32.mxu0 %v5375_v26 }
  0xaa   :  { %3461 = vmatmul.mubr.f32.gmra.mrb[4].mxu0 %v5376_v41 }
  0xab   :  { %3463 = vmatprep.mubr.f32.mxu0 %v5377_v40 }
  0xae   :  { %3464 = vmatmul.mubr.f32.gmra.mrb[6].mxu0 %v5378_v44 }
  0xaf   :  { %3466 = vmatprep.mubr.f32.mxu0 %v5379_v49 }
  0xb2   :  { %3467 = vmatmul.mubr.f32.gmra.mrb[8].mxu0 %v5380_v35 }
  0xb3   :  { %3469 = vmatprep.mubr.f32.mxu0 %v4115_v3 }
  0xb6   :  { %3470 = vmatmul.mubr.f32.gmra.mrb[10].mxu0 %v4135_v18 }
  0xb7   :  { %3472 = vmatprep.mubr.f32.mxu0 %v4145_v24 }
  0xba   :  { %3473 = vmatmul.mubr.f32.gmra.mrb[12].mxu0 %v4156_v34 }
  0xbb   :  { %3475 = vmatprep.mubr.f32.mxu0 %v4176_v56 }
  0xbe   :  { %3476 = vmatmul.mubr.f32.gmra.mrb[14].mxu0 %v4192_v9 }
  0xbf   :  { %3478 = vmatprep.mubr.f32.mxu0 %v4201_v23 }
  0xc2   :  { %3479 = vmatmul.mubr.f32.gmra.mrb[16].mxu0 %v4212_v30 }
  0xc3   :  { %3481 = vmatprep.mubr.f32.mxu0 %v4229_v0 }
  0xc6   :  { %3482 = vmatmul.mubr.f32.gmra.mrb[18].mxu0 %v4246_v31 }
  0xc7   :  { %3484 = vmatprep.mubr.f32.mxu0 %v4258_v1 }
  0xca   :  { %3485 = vmatmul.mubr.f32.gmra.mrb[20].mxu0 %v4271_v10 }
  0xcb   :  { %3487 = vmatprep.mubr.f32.mxu0 %v4273_v45 }
  0xce   :  { %3488 = vmatmul.mubr.f32.gmra.mrb[22].mxu0 %v4299_v60 }
  0xcf   :  { %3490 = vmatprep.mubr.f32.mxu0 %v4305_v59 }
  0xd2   :  { %3491 = vmatmul.mubr.f32.gmra.mrb[24].mxu0 %v4330_v32 }
  0xd3   :  { %3493 = vmatprep.mubr.f32.mxu0 %v4341_v27 }
  0xd6   :  { %3494 = vmatmul.mubr.f32.gmra.mrb[26].mxu0 %v4358_v22 }
  0xd7   :  { %3496 = vmatprep.mubr.f32.mxu0 %v4361_v17 }
  0xda   :  { %3497 = vmatmul.mubr.f32.gmra.mrb[28].mxu0 %v4384_v57 }
  0xdb   :  { %3499 = vmatprep.mubr.f32.mxu0 %v4386_v43 }
  0xde   :  { %3500 = vmatmul.mubr.f32.gmra.mrb[30].mxu0 %v4405_v11 }
  0xdf   :  { %3504 = vmatprep.mubr.f32.mxu0 %v5371_v61 }
  0xe2   :  { %3505 = vmatmul.mubr.f32.vlgmr.msra.gmra.mrb[0].mxu0 %v5372_v58 }
  0xe3   :  { %3507 = vmatprep.mubr.f32.mxu0 %v5373_v15  ;;  %v4682_v15 = vsub.f32 %v4671_v20, %v5256_v51 }
  0xe6   :  { %3508 = vmatmul.mubr.f32.gmra.mrb[2].mxu0 %v5374_v5 }
  0xe7   :  { %3510 = vmatprep.mubr.f32.mxu0 %v5375_v26 }
  0xea   :  { %3511 = vmatmul.mubr.f32.gmra.mrb[4].mxu0 %v5376_v41 }
  0xeb   :  { %3513 = vmatprep.mubr.f32.mxu0 %v5377_v40 }
  0xec   :  { %v3256_v2 = vpop.f32.mrb[0].mxu1 }
  0xed   :  { %v4572_v50 = vpop.f32.mrb[1].mxu1 }
  0xee   :  { %3514 = vmatmul.mubr.f32.gmra.mrb[6].mxu0 %v5378_v44 }
  0xef   :  { %3516 = vmatprep.mubr.f32.mxu0 %v5379_v49 }
  0xf0   :  { %v4576_v53 = vpop.f32.mrb[2].mxu1 }
  0xf1   :  { %v4578_v36 = vpop.f32.mrb[3].mxu1 }
  0xf2   :  { %3517 = vmatmul.mubr.f32.gmra.mrb[8].mxu0 %v5380_v35 }
  0xf3   :  { %3519 = vmatprep.mubr.f32.mxu0 %v4115_v3 }
  0xf4   :  { %v4582_v3 = vpop.f32.mrb[4].mxu1 }
  0xf6   :  { %3520 = vmatmul.mubr.f32.gmra.mrb[10].mxu0 %v4135_v18  ;;  %v4584_v18 = vpop.f32.mrb[5].mxu1 }
  0xf7   :  { %3522 = vmatprep.mubr.f32.mxu0 %v4145_v24 }
  0xf8   :  { %v4588_v24 = vpop.f32.mrb[6].mxu1 }
  0xfa   :  { %3523 = vmatmul.mubr.f32.gmra.mrb[12].mxu0 %v4156_v34  ;;  %v4590_v34 = vpop.f32.mrb[7].mxu1 }
  0xfb   :  { %3525 = vmatprep.mubr.f32.mxu0 %v4176_v56 }
  0xfc   :  { %v4594_v56 = vpop.f32.mrb[8].mxu1 }
  0xfe   :  { %3526 = vmatmul.mubr.f32.gmra.mrb[14].mxu0 %v4192_v9  ;;  %v4596_v9 = vpop.f32.mrb[9].mxu1 }
  0xff   :  { %3528 = vmatprep.mubr.f32.mxu0 %v4201_v23 }
 0x102   :  { %3529 = vmatmul.mubr.f32.gmra.mrb[16].mxu0 %v4212_v30 }
 0x103   :  { %3531 = vmatprep.mubr.f32.mxu0 %v4229_v0 }
 0x106   :  { %3532 = vmatmul.mubr.f32.gmra.mrb[18].mxu0 %v4246_v31 }
 0x107   :  { %3534 = vmatprep.mubr.f32.mxu0 %v4258_v1 }
 0x10a   :  { %3535 = vmatmul.mubr.f32.gmra.mrb[20].mxu0 %v4271_v10 }
 0x10b   :  { %3537 = vmatprep.mubr.f32.mxu0 %v4273_v45 }
 0x10e   :  { %3538 = vmatmul.mubr.f32.gmra.mrb[22].mxu0 %v4299_v60 }
 0x10f   :  { %3540 = vmatprep.mubr.f32.mxu0 %v4305_v59 }
 0x112   :  { %3541 = vmatmul.mubr.f32.gmra.mrb[24].mxu0 %v4330_v32 }
 0x113   :  { %3543 = vmatprep.mubr.f32.mxu0 %v4341_v27 }
 0x116   :  { %3544 = vmatmul.mubr.f32.gmra.mrb[26].mxu0 %v4358_v22 }
 0x117   :  { %3546 = vmatprep.mubr.f32.mxu0 %v4361_v17 }
 0x11a   :  { %3547 = vmatmul.mubr.f32.gmra.mrb[28].mxu0 %v4384_v57 }
 0x11b   :  { %3549 = vmatprep.mubr.f32.mxu0 %v4386_v43 }
 0x11e   :  { %3550 = vmatmul.mubr.f32.gmra.mrb[30].mxu0 %v4405_v11 }
 0x131   :  { %v4609_v31 = vpop.f32.mrb[10].mxu1 }
 0x132   :  { %v4611_v0 = vpop.f32.mrb[11].mxu1 }
 0x135   :  { %v4613_v23 = vpop.f32.mrb[12].mxu1 }
 0x136   :  { %v4615_v45 = vpop.f32.mrb[13].mxu1 }
 0x139   :  { %v4617_v32 = vpop.f32.mrb[14].mxu1 }
 0x13a   :  { %v4619_v27 = vpop.f32.mrb[15].mxu1 }
 0x13d   :  { %v4621_v22 = vpop.f32.mrb[16].mxu1 }
 0x13e   :  { %v4623_v30 = vpop.f32.mrb[17].mxu1 }
 0x141   :  { %v4625_v1 = vpop.f32.mrb[18].mxu1 }
 0x142   :  { %v4627_v10 = vpop.f32.mrb[19].mxu1 }
 0x145   :  { %v4629_v11 = vpop.f32.mrb[20].mxu1 }
 0x146   :  { %v4631_v60 = vpop.f32.mrb[21].mxu1 }
 0x149   :  { %v4633_v59 = vpop.f32.mrb[22].mxu1 }
 0x14a   :  { %v4635_v17 = vpop.f32.mrb[23].mxu1 }
 0x14d   :  { %v4637_v57 = vpop.f32.mrb[24].mxu1 }
 0x14e   :  { %v4639_v43 = vpop.f32.mrb[25].mxu1 }
 0x151   :  { %v4641_v37 = vpop.f32.mrb[26].mxu1 }
 0x152   :  { %v4643_v8 = vpop.f32.mrb[27].mxu1 }
 0x155   :  { %v4645_v38 = vpop.f32.mrb[28].mxu1 }
 0x156   :  { %v4647_v39 = vpop.f32.mrb[29].mxu1 }
 0x159   :  { %v4649_v42 = vpop.f32.mrb[30].mxu1 }
 0x15a   :  { %v4651_v48 = vpop.f32.mrb[31].mxu1 }
 0x1b5   :  { %v3506_v54 = vpop.f32.mrb[0].mxu0 }
 0x1b6   :  { %v3746_v6 = vadd.f32 %v3506_v54, %v3256_v2  ;;  %v1737_v29 = vpop.f32.mrb[1].mxu0 }
 0x1b7   :  { %v3747_v46 = vadd.f32 %v1737_v29, %v4572_v50 }
 0x1b8   :  { %v1928_v33 = vmax.f32 %v3746_v6, 0.0 }
 0x1b9   :  { %v1927_v19 = vmax.f32 %v3747_v46, 0.0  ;;  %v3509_v13 = vpop.f32.mrb[2].mxu0 }
 0x1ba   :  { %v1971_v4 = vand.u32 4294901760, %v1928_v33  ;;  %v3748_v28 = vadd.f32 %v3509_v13, %v4576_v53  ;;  %v1749_v21 = vpop.f32.mrb[3].mxu0 }
 0x1bb   :  { %v1968_v16 = vand.u32 4294901760, %v1927_v19  ;;  %v3749_v25 = vadd.f32 %v1749_v21, %v4578_v36 }
 0x1bc   :  { %v4677_v61 = vsub.f32 %v1928_v33, %v1971_v4  ;;  %v1930_v58 = vmax.f32 %v3748_v28, 0.0 }
 0x1bd   :  { %v4684_v5 = vpack.c.bf16 %v1971_v4, %v1968_v16  ;;  %v4686_v26 = vsub.f32 %v1927_v19, %v1968_v16  ;;  %v1929_v41 = vmax.f32 %v3749_v25, 0.0  ;;  %v3512_v40 = vpop.f32.mrb[4].mxu0 }
 0x1be   :  { %v5262_v44 = vand.u32 4294901760, %v4677_v61  ;;  %v1977_v49 = vand.u32 4294901760, %v1930_v58  ;;  %v3750_v35 = vadd.f32 %v3512_v40, %v4582_v3  ;;  %v1761_v2 = vpop.f32.mrb[5].mxu0 }
 0x1bf   :  { %5385 = vst [vmem:[#allocation5_spill] sm:$0xff] %v4684_v5  ;;  %v5264_v50 = vand.u32 4294901760, %v4686_v26  ;;  %v1974_v53 = vand.u32 4294901760, %v1929_v41  ;;  %v3751_v36 = vadd.f32 %v1761_v2, %v4584_v18 }
 0x1c0   :  { %v2090_v14 = vsub.f32 %v4677_v61, %v5262_v44  ;;  %v4697_v47 = vsub.f32 %v1930_v58, %v1977_v49  ;;  %v1932_v55 = vmax.f32 %v3750_v35, 0.0 }
 0x1c1   :  { %v2083_v3 = vsub.f32 %v4686_v26, %v5264_v50  ;;  %v4703_v6 = vpack.c.bf16 %v1977_v49, %v1974_v53  ;;  %v4705_v29 = vsub.f32 %v1929_v41, %v1974_v53  ;;  %v1931_v18 = vmax.f32 %v3751_v36, 0.0  ;;  %v3515_v46 = vpop.f32.mrb[6].mxu0 }
 0x1c2   :  { %v2091_v33 = vand.u32 4294901760, %v2090_v14  ;;  %v5258_v19 = vand.u32 4294901760, %v4697_v47  ;;  %v1983_v13 = vand.u32 4294901760, %v1932_v55  ;;  %v3752_v4 = vadd.f32 %v3515_v46, %v4588_v24  ;;  %v1773_v28 = vpop.f32.mrb[7].mxu0 }
 0x1c3   :  { %5386 = vst [vmem:[#allocation6_spill] sm:$0xff] %v4703_v6  ;;  %v2084_v21 = vand.u32 4294901760, %v2083_v3  ;;  %v5260_v16 = vand.u32 4294901760, %v4705_v29  ;;  %v1980_v25 = vand.u32 4294901760, %v1931_v18  ;;  %v3753_v58 = vadd.f32 %v1773_v28, %v4590_v34 }
 0x1c4   :  { %v2104_v41 = vsub.f32 %v4697_v47, %v5258_v19  ;;  %v4714_v40 = vsub.f32 %v1932_v55, %v1983_v13  ;;  %v1934_v49 = vmax.f32 %v3752_v4, 0.0 }
 0x1c5   :  { %v2097_v24 = vsub.f32 %v4705_v29, %v5260_v16  ;;  %v4721_v2 = vpack.c.bf16 %v1983_v13, %v1980_v25  ;;  %v4723_v53 = vsub.f32 %v1931_v18, %v1980_v25  ;;  %v1933_v36 = vmax.f32 %v3753_v58, 0.0  ;;  %v3518_v34 = vpop.f32.mrb[8].mxu0 }
 0x1c6   :  { %v2105_v14 = vand.u32 4294901760, %v2104_v41  ;;  %v5259_v3 = vand.u32 4294901760, %v4714_v40  ;;  %v1989_v46 = vand.u32 4294901760, %v1934_v49  ;;  %v3754_v55 = vadd.f32 %v3518_v34, %v4594_v56  ;;  %v1785_v4 = vpop.f32.mrb[9].mxu0 }
 0x1c7   :  { %5387 = vst [vmem:[#allocation7_spill] sm:$0xff] %v4721_v2  ;;  %v2098_v28 = vand.u32 4294901760, %v2097_v24  ;;  %v5261_v51 = vand.u32 4294901760, %v4723_v53  ;;  %v1986_v12 = vand.u32 4294901760, %v1933_v36  ;;  %v3755_v35 = vadd.f32 %v1785_v4, %v4596_v9 }
 0x1c8   :  { %v2118_v18 = vsub.f32 %v4714_v40, %v5259_v3  ;;  %v4732_v13 = vsub.f32 %v1934_v49, %v1989_v46  ;;  %v1936_v25 = vmax.f32 %v3754_v55, 0.0  ;;  %v4734_v58 = vpack.c.bf16 %v2091_v33, %v2084_v21 }
 0x1c9   :  { %v2111_v56 = vsub.f32 %v4723_v53, %v5261_v51  ;;  %v4739_v41 = vpack.c.bf16 %v1989_v46, %v1986_v12  ;;  %v4741_v24 = vsub.f32 %v1933_v36, %v1986_v12  ;;  %v1935_v34 = vmax.f32 %v3755_v35, 0.0  ;;  %v3521_v52 = vpop.f32.mrb[10].mxu0 }
 0x1ca   :  { %v2119_v9 = vand.u32 4294901760, %v2118_v18  ;;  %v5263_v4 = vand.u32 4294901760, %v4732_v13  ;;  %v1995_v19 = vand.u32 4294901760, %v1936_v25  ;;  %v3756_v49 = vadd.f32 %v3521_v52, %v4609_v31  ;;  %v1797_v3 = vpop.f32.mrb[11].mxu0 }
 0x1cb   :  { %5388 = vst [vmem:[#allocation8_spill] sm:$0xff] %v4739_v41  ;;  %v2112_v55 = vand.u32 4294901760, %v2111_v56  ;;  %v5265_v33 = vand.u32 4294901760, %v4741_v24  ;;  %v1992_v21 = vand.u32 4294901760, %v1935_v34  ;;  %v3757_v16 = vadd.f32 %v1797_v3, %v4611_v0 }
 0x1cc   :  { %v2132_v12 = vsub.f32 %v4732_v13, %v5263_v4  ;;  %v4750_v36 = vsub.f32 %v1936_v25, %v1995_v19  ;;  %v1938_v35 = vmax.f32 %v3756_v49, 0.0  ;;  %v4752_v46 = vpack.c.bf16 %v2105_v14, %v2098_v28 }
 0x1cd   :  { %v2125_v31 = vsub.f32 %v4741_v24, %v5265_v33  ;;  %v4757_v52 = vpack.c.bf16 %v1995_v19, %v1992_v21  ;;  %v4759_v18 = vsub.f32 %v1935_v34, %v1992_v21  ;;  %v1937_v56 = vmax.f32 %v3757_v16, 0.0  ;;  %v3524_v51 = vpop.f32.mrb[12].mxu0 }
 0x1ce   :  { %v2133_v0 = vand.u32 4294901760, %v2132_v12  ;;  %v5266_v3 = vand.u32 4294901760, %v4750_v36  ;;  %v2001_v44 = vand.u32 4294901760, %v1938_v35  ;;  %v3758_v25 = vadd.f32 %v3524_v51, %v4613_v23  ;;  %v1809_v4 = vpop.f32.mrb[13].mxu0 }
 0x1cf   :  { %5389 = vst [vmem:[#allocation9_spill] sm:$0xff] %v4757_v52  ;;  %v2126_v49 = vand.u32 4294901760, %v2125_v31  ;;  %v5269_v14 = vand.u32 4294901760, %v4759_v18  ;;  %v1998_v28 = vand.u32 4294901760, %v1937_v56  ;;  %v3759_v50 = vadd.f32 %v1809_v4, %v4615_v45 }
 0x1d0   :  { %v2146_v19 = vsub.f32 %v4750_v36, %v5266_v3  ;;  %v4768_v34 = vsub.f32 %v1938_v35, %v2001_v44  ;;  %v1940_v16 = vmax.f32 %v3758_v25, 0.0  ;;  %v4770_v21 = vpack.c.bf16 %v2119_v9, %v2112_v55 }
 0x1d1   :  { %v2139_v23 = vsub.f32 %v4759_v18, %v5269_v14  ;;  %v4775_v51 = vpack.c.bf16 %v2001_v44, %v1998_v28  ;;  %v4777_v12 = vsub.f32 %v1937_v56, %v1998_v28  ;;  %v1939_v31 = vmax.f32 %v3759_v50, 0.0  ;;  %v3527_v33 = vpop.f32.mrb[14].mxu0 }
 0x1d2   :  { %5390 = vst [vmem:[#allocation10_spill] sm:$0xff] %v4770_v21  ;;  %v2147_v45 = vand.u32 4294901760, %v2146_v19  ;;  %v5272_v4 = vand.u32 4294901760, %v4768_v34  ;;  %v2007_v54 = vand.u32 4294901760, %v1940_v16  ;;  %v3760_v35 = vadd.f32 %v3527_v33, %v4617_v32  ;;  %v1821_v3 = vpop.f32.mrb[15].mxu0 }
 0x1d3   :  { %5391 = vst [vmem:[#allocation11_spill] sm:$0xff] %v4775_v51  ;;  %v2140_v25 = vand.u32 4294901760, %v2139_v23  ;;  %v5275_v9 = vand.u32 4294901760, %v4777_v12  ;;  %v2004_v55 = vand.u32 4294901760, %v1939_v31  ;;  %v3761_v20 = vadd.f32 %v1821_v3, %v4619_v27 }
 0x1d4   :  { %v2160_v44 = vsub.f32 %v4768_v34, %v5272_v4  ;;  %v4786_v56 = vsub.f32 %v1940_v16, %v2007_v54  ;;  %v1942_v50 = vmax.f32 %v3760_v35, 0.0  ;;  %v4788_v28 = vpack.c.bf16 %v2133_v0, %v2126_v49 }
 0x1d5   :  { %v2153_v32 = vsub.f32 %v4777_v12, %v5275_v9  ;;  %v4793_v33 = vpack.c.bf16 %v2007_v54, %v2004_v55  ;;  %v4795_v19 = vsub.f32 %v1939_v31, %v2004_v55  ;;  %v1941_v23 = vmax.f32 %v3761_v20, 0.0  ;;  %v3530_v14 = vpop.f32.mrb[16].mxu0 }
 0x1d6   :  { %5392 = vst [vmem:[#allocation12_spill] sm:$0xff] %v4788_v28  ;;  %v2161_v27 = vand.u32 4294901760, %v2160_v44  ;;  %v5276_v3 = vand.u32 4294901760, %v4786_v56  ;;  %v2013_v63 = vand.u32 4294901760, %v1942_v50  ;;  %v3762_v16 = vadd.f32 %v3530_v14, %v4621_v22  ;;  %v1833_v4 = vpop.f32.mrb[17].mxu0 }
 0x1d7   :  { %5393 = vst [vmem:[#allocation13_spill] sm:$0xff] %v4793_v33  ;;  %v2154_v35 = vand.u32 4294901760, %v2153_v32  ;;  %v5277_v0 = vand.u32 4294901760, %v4795_v19  ;;  %v2010_v49 = vand.u32 4294901760, %v1941_v23  ;;  %v3763_v7 = vadd.f32 %v1833_v4, %v4623_v30 }
 0x1d8   :  { %v2174_v54 = vsub.f32 %v4786_v56, %v5276_v3  ;;  %v4804_v31 = vsub.f32 %v1942_v50, %v2013_v63  ;;  %v1944_v20 = vmax.f32 %v3762_v16, 0.0  ;;  %v4806_v55 = vpack.c.bf16 %v2147_v45, %v2140_v25 }
 0x1d9   :  { %v2167_v22 = vsub.f32 %v4795_v19, %v5277_v0  ;;  %v4811_v14 = vpack.c.bf16 %v2013_v63, %v2010_v49  ;;  %v4813_v44 = vsub.f32 %v1941_v23, %v2010_v49  ;;  %v1943_v32 = vmax.f32 %v3763_v7, 0.0  ;;  %v3533_v9 = vpop.f32.mrb[18].mxu0 }
 0x1da   :  { %5394 = vst [vmem:[#allocation14_spill] sm:$0xff] %v4806_v55  ;;  %v2175_v30 = vand.u32 4294901760, %v2174_v54  ;;  %v5278_v4 = vand.u32 4294901760, %v4804_v31  ;;  %v2019_v28 = vand.u32 4294901760, %v1944_v20  ;;  %v3764_v50 = vadd.f32 %v3533_v9, %v4625_v1  ;;  %v1845_v3 = vpop.f32.mrb[19].mxu0 }
 0x1db   :  { %5395 = vst [vmem:[#allocation19_spill] sm:$0xff] %v4811_v14  ;;  %v2168_v16 = vand.u32 4294901760, %v2167_v22  ;;  %v5279_v45 = vand.u32 4294901760, %v4813_v44  ;;  %v2016_v25 = vand.u32 4294901760, %v1943_v32  ;;  %v3765_v55 = vadd.f32 %v1845_v3, %v4627_v10 }
 0x1dc   :  { %v2188_v63 = vsub.f32 %v4804_v31, %v5278_v4  ;;  %v4822_v23 = vsub.f32 %v1944_v20, %v2019_v28  ;;  %v1946_v7 = vmax.f32 %v3764_v50, 0.0  ;;  %v4824_v49 = vpack.c.bf16 %v2161_v27, %v2154_v35 }
 0x1dd   :  { %v2181_v1 = vsub.f32 %v4813_v44, %v5279_v45  ;;  %v4829_v9 = vsub.f32 %v1943_v32, %v2016_v25  ;;  %v1945_v54 = vmax.f32 %v3765_v55, 0.0  ;;  %v3536_v22 = vpop.f32.mrb[20].mxu0  ;;  %v4831_v0 = vpack.c.bf16 %v2019_v28, %v2016_v25 }
 0x1de   :  { %5396 = vst [vmem:[#allocation20_spill] sm:$0xff] %v4824_v49  ;;  %v2189_v10 = vand.u32 4294901760, %v2188_v63  ;;  %v5282_v3 = vand.u32 4294901760, %v4822_v23  ;;  %v2025_v21 = vand.u32 4294901760, %v1946_v7  ;;  %v3766_v20 = vadd.f32 %v3536_v22, %v4629_v11  ;;  %v1857_v4 = vpop.f32.mrb[21].mxu0 }
 0x1df   :  { %5397 = vst [vmem:[#allocation21_spill] sm:$0xff] %v4831_v0  ;;  %v2182_v50 = vand.u32 4294901760, %v2181_v1  ;;  %v5283_v27 = vand.u32 4294901760, %v4829_v9  ;;  %v2022_v35 = vand.u32 4294901760, %v1945_v54  ;;  %v3767_v49 = vadd.f32 %v1857_v4, %v4631_v60  ;;  %3553 = vmatprep.subr.bf16.mxu1 %v4831_v0 }
 0x1e0   :  { %v4838_v32 = vsub.f32 %v1946_v7, %v2025_v21  ;;  %v1948_v55 = vmax.f32 %v3766_v20, 0.0  ;;  %3555 = vmatpush3.bf16.msra.mxu1 %v4684_v5  ;;  %v2202_v28 = vsub.f32 %v4822_v23, %v5282_v3  ;;  %v4844_v25 = vpack.c.bf16 %v2175_v30, %v2168_v16 }
 0x1e1   :  { %v4846_v11 = vsub.f32 %v1945_v54, %v2022_v35  ;;  %v1947_v63 = vmax.f32 %v3767_v49, 0.0  ;;  %v3539_v1 = vpop.f32.mrb[22].mxu0  ;;  %v4848_v22 = vpack.c.bf16 %v2025_v21, %v2022_v35  ;;  %v2195_v60 = vsub.f32 %v4829_v9, %v5283_v27 }
 0x1e2   :  { %5398 = vst [vmem:[#allocation22_spill] sm:$0xff] %v4844_v25  ;;  %v5286_v4 = vand.u32 4294901760, %v4838_v32  ;;  %v2031_v7 = vand.u32 4294901760, %v1948_v55  ;;  %v3768_v20 = vadd.f32 %v3539_v1, %v4633_v59  ;;  %v1869_v45 = vpop.f32.mrb[23].mxu0  ;;  %v2203_v5 = vand.u32 4294901760, %v2202_v28 }
 0x1e3   :  { %5399 = vst [vmem:[#allocation23_spill] sm:$0xff] %v4848_v22  ;;  %v2028_v16 = vand.u32 4294901760, %v1947_v63  ;;  %v3769_v54 = vadd.f32 %v1869_v45, %v4635_v17  ;;  %3557 = vmatprep.subr.bf16.mxu1 %v4848_v22  ;;  %v2196_v21 = vand.u32 4294901760, %v2195_v60  ;;  %v4864_v59 = vpack.c.bf16 %v2189_v10, %v2182_v50 }
 0x1e4   :  { %v4858_v49 = vsub.f32 %v1948_v55, %v2031_v7  ;;  %v1950_v35 = vmax.f32 %v3768_v20, 0.0  ;;  %3559 = vmatpush3.bf16.msra.mxu1 %v4703_v6  ;;  %v2216_v3 = vsub.f32 %v4838_v32, %v5286_v4  ;;  %v5402_v6 = vand.u32 4294901760, %v4846_v11 }
 0x1e5   :  { %5400 = vst [vmem:[#allocation24_spill] sm:$0xff] %v4864_v59  ;;  %v4866_v28 = vsub.f32 %v1947_v63, %v2028_v16  ;;  %v1949_v1 = vmax.f32 %v3769_v54, 0.0  ;;  %v3542_v27 = vpop.f32.mrb[24].mxu0  ;;  %v4868_v30 = vpack.c.bf16 %v2031_v7, %v2028_v16  ;;  %v4870_v17 = vpack.c.bf16 %v2203_v5, %v2196_v21 }
 0x1e6   :  { %v5289_v45 = vand.u32 4294901760, %v4858_v49  ;;  %v2037_v55 = vand.u32 4294901760, %v1950_v35  ;;  %v3770_v60 = vadd.f32 %v3542_v27, %v4637_v57  ;;  %v1881_v20 = vpop.f32.mrb[25].mxu0  ;;  %v2209_v4 = vsub.f32 %v4846_v11, %v5402_v6 }
 0x1e7   :  { %5401 = vst [vmem:[#allocation25_spill] sm:$0xff] %v4868_v30  ;;  %v2034_v50 = vand.u32 4294901760, %v1949_v1  ;;  %v3771_v63 = vadd.f32 %v1881_v20, %v4639_v43  ;;  %3561 = vmatprep.subr.bf16.mxu1 %v4868_v30  ;;  %v2217_v7 = vand.u32 4294901760, %v2216_v3  ;;  %v5404_v43 = vand.u32 4294901760, %v4866_v28 }
 0x1e8   :  { %v4880_v5 = vsub.f32 %v1950_v35, %v2037_v55  ;;  %v1952_v16 = vmax.f32 %v3770_v60, 0.0  ;;  %3563 = vmatpush3.bf16.msra.mxu1 %v4721_v2  ;;  %v2210_v54 = vand.u32 4294901760, %v2209_v4  ;;  %v2230_v57 = vsub.f32 %v4858_v49, %v5289_v45 }
 0x1e9   :  { %v4886_v27 = vsub.f32 %v1949_v1, %v2034_v50  ;;  %v1951_v6 = vmax.f32 %v3771_v63, 0.0  ;;  %v3545_v21 = vpop.f32.mrb[26].mxu0  ;;  %v4888_v10 = vpack.c.bf16 %v2037_v55, %v2034_v50  ;;  %v2223_v3 = vsub.f32 %v4866_v28, %v5404_v43 }
 0x1ea   :  { %v5294_v35 = vand.u32 4294901760, %v4880_v5  ;;  %v2043_v60 = vand.u32 4294901760, %v1952_v16  ;;  %v3772_v20 = vadd.f32 %v3545_v21, %v4641_v37  ;;  %v1893_v4 = vpop.f32.mrb[27].mxu0  ;;  %v4895_v2 = vpack.c.bf16 %v2217_v7, %v2210_v54 }
 0x1eb   :  { %5403 = vst [vmem:[#allocation26_spill] sm:$0xff] %v4888_v10  ;;  %v2040_v1 = vand.u32 4294901760, %v1951_v6  ;;  %v3773_v63 = vadd.f32 %v1893_v4, %v4643_v8  ;;  %3565 = vmatprep.subr.bf16.mxu1 %v4888_v10  ;;  %v2224_v55 = vand.u32 4294901760, %v2223_v3  ;;  %v2231_v43 = vand.u32 4294901760, %v2230_v57 }
 0x1ec   :  { %v4900_v50 = vsub.f32 %v1952_v16, %v2043_v60  ;;  %v1954_v30 = vmax.f32 %v3772_v20, 0.0  ;;  %3567 = vmatpush3.bf16.msra.mxu1 %v4739_v41  ;;  %v2244_v37 = vsub.f32 %v4880_v5, %v5294_v35  ;;  %v5406_v8 = vand.u32 4294901760, %v4886_v27 }
 0x1ed   :  { %v4906_v7 = vsub.f32 %v1951_v6, %v2040_v1  ;;  %v1953_v54 = vmax.f32 %v3773_v63, 0.0  ;;  %v3548_v21 = vpop.f32.mrb[28].mxu0  ;;  %v4908_v45 = vpack.c.bf16 %v2043_v60, %v2040_v1  ;;  %v4915_v41 = vpack.c.bf16 %v2231_v43, %v2224_v55 }
 0x1ee   :  { %v2237_v3 = vsub.f32 %v4886_v27, %v5406_v8  ;;  %v5299_v16 = vand.u32 4294901760, %v4900_v50  ;;  %v2049_v20 = vand.u32 4294901760, %v1954_v30  ;;  %v3774_v4 = vadd.f32 %v3548_v21, %v4645_v38  ;;  %v1905_v57 = vpop.f32.mrb[29].mxu0 }
 0x1ef   :  { %5405 = vst [vmem:[#allocation27_spill] sm:$0xff] %v4908_v45  ;;  %v2046_v6 = vand.u32 4294901760, %v1953_v54  ;;  %v3775_v63 = vadd.f32 %v1905_v57, %v4647_v39  ;;  %3569 = vmatprep.subr.bf16.mxu1 %v4908_v45  ;;  %v2245_v8 = vand.u32 4294901760, %v2244_v37  ;;  %v5408_v39 = vand.u32 4294901760, %v4906_v7 }
 0x1f0   :  { %v2238_v60 = vand.u32 4294901760, %v2237_v3  ;;  %v4920_v1 = vsub.f32 %v1954_v30, %v2049_v20  ;;  %v1956_v10 = vmax.f32 %v3774_v4, 0.0  ;;  %3571 = vmatpush3.bf16.msra.mxu1 %v4757_v52  ;;  %v2258_v38 = vsub.f32 %v4900_v50, %v5299_v16 }
 0x1f1   :  { %v4926_v55 = vsub.f32 %v1953_v54, %v2046_v6  ;;  %v1955_v43 = vmax.f32 %v3775_v63, 0.0  ;;  %v3551_v21 = vpop.f32.mrb[30].mxu0  ;;  %v4928_v35 = vpack.c.bf16 %v2049_v20, %v2046_v6  ;;  %v2251_v3 = vsub.f32 %v4906_v7, %v5408_v39 }
 0x1f2   :  { %v5304_v30 = vand.u32 4294901760, %v4920_v1  ;;  %v2055_v4 = vand.u32 4294901760, %v1956_v10  ;;  %v3776_v57 = vadd.f32 %v3551_v21, %v4649_v42  ;;  %v1917_v37 = vpop.f32.mrb[31].mxu0  ;;  %v4935_v52 = vpack.c.bf16 %v2245_v8, %v2238_v60 }
 0x1f3   :  { %5407 = vst [vmem:[#allocation28_spill] sm:$0xff] %v4928_v35  ;;  %v5305_v16 = vand.u32 4294901760, %v4926_v55  ;;  %v2052_v54 = vand.u32 4294901760, %v1955_v43  ;;  %v3777_v63 = vadd.f32 %v1917_v37, %v4651_v48  ;;  %3573 = vmatprep.subr.bf16.mxu1 %v4928_v35  ;;  %v2252_v20 = vand.u32 4294901760, %v2251_v3 }
 0x1f4   :  { %v4940_v6 = vsub.f32 %v1956_v10, %v2055_v4  ;;  %v1958_v45 = vmax.f32 %v3776_v57, 0.0  ;;  %3575 = vmatpush3.bf16.msra.mxu1 %v4775_v51  ;;  %v2259_v39 = vand.u32 4294901760, %v2258_v38  ;;  %v2272_v42 = vsub.f32 %v4920_v1, %v5304_v30 }
 0x1f5   :  { %v4946_v60 = vsub.f32 %v1955_v43, %v2052_v54  ;;  %v1957_v8 = vmax.f32 %v3777_v63, 0.0  ;;  %v4948_v21 = vpack.c.bf16 %v2055_v4, %v2052_v54  ;;  %v2265_v48 = vsub.f32 %v4926_v55, %v5305_v16 }
 0x1f6   :  { %v2285_v10 = vand.u32 4294901760, %v4940_v6  ;;  %v2061_v3 = vand.u32 4294901760, %v1958_v45  ;;  %v4954_v57 = vpack.c.bf16 %v2259_v39, %v2252_v20  ;;  %v2273_v37 = vand.u32 4294901760, %v2272_v42 }
 0x1f7   :  { %5409 = vst [vmem:[#allocation29_spill] sm:$0xff] %v4948_v21  ;;  %v2278_v38 = vand.u32 4294901760, %v4946_v60  ;;  %v2058_v51 = vand.u32 4294901760, %v1957_v8  ;;  %3577 = vmatprep.subr.bf16.mxu1 %v4948_v21  ;;  %v2266_v43 = vand.u32 4294901760, %v2265_v48  ;;  %v3638_v21 = vpack.c.bf16 %v4768_v34, %v4777_v12 }
 0x1f8   :  { %v4960_v54 = vsub.f32 %v1958_v45, %v2061_v3  ;;  %3579 = vmatpush3.bf16.msra.mxu1 %v4793_v33  ;;  %v2286_v63 = vsub.f32 %v4940_v6, %v2285_v10  ;;  %v3640_v39 = vpack.c.bf16 %v4940_v6, %v4946_v60  ;;  %v3646_v22 = vpack.c.bf16 %v4804_v31, %v4813_v44 }
 0x1f9   :  { %v4968_v42 = vsub.f32 %v1957_v8, %v2058_v51  ;;  %v4970_v30 = vpack.c.bf16 %v2061_v3, %v2058_v51  ;;  %v3604_v48 = vpack.c.bf16 %v2273_v37, %v2266_v43  ;;  %v2279_v16 = vsub.f32 %v4946_v60, %v2278_v38 }
 0x1fa   :  { %v2299_v45 = vand.u32 4294901760, %v4960_v54  ;;  %v2287_v4 = vand.u32 4294901760, %v2286_v63  ;;  %v3630_v51 = vpack.c.bf16 %v4732_v13, %v4741_v24  ;;  %v3632_v3 = vpack.c.bf16 %v4900_v50, %v4906_v7 }
 0x1fb   :  { %5410 = vst [vmem:[#allocation30_spill] sm:$0xff] %v4970_v30  ;;  %v2292_v20 = vand.u32 4294901760, %v4968_v42  ;;  %3581 = vmatprep.subr.bf16.mxu1 %v4970_v30  ;;  %v2280_v8 = vand.u32 4294901760, %v2279_v16  ;;  %v3634_v43 = vpack.c.bf16 %v4750_v36, %v4759_v18  ;;  %v3636_v63 = vpack.c.bf16 %v4920_v1, %v4926_v55 }
 0x1fc   :  { %3583 = vmatpush3.bf16.msra.mxu1 %v4811_v14  ;;  %v2300_v37 = vsub.f32 %v4960_v54, %v2299_v45  ;;  %v3642_v14 = vpack.c.bf16 %v4786_v56, %v4795_v19  ;;  %v3644_v35 = vpack.c.bf16 %v4960_v54, %v4968_v42  ;;  %v5411_v0 = vand.u32 4294901760, %v4829_v9 }
 0x1fd   :  { %3585 = vmatprep.subr.bf16.mxu1 %v4870_v17  ;;  %v3608_v16 = vpack.c.bf16 %v2287_v4, %v2280_v8  ;;  %v2293_v33 = vsub.f32 %v4968_v42, %v2292_v20  ;;  %v5412_v17 = vand.u32 4294901760, %v4822_v23  ;;  %v5413_v8 = vand.u32 4294901760, %v4682_v15 }
 0x1fe   :  { %v2301_v30 = vand.u32 4294901760, %v2300_v37  ;;  %v5414_v60 = vand.u32 4294901760, %v4686_v26  ;;  %v5415_v37 = vand.u32 4294901760, %v4677_v61  ;;  %v5416_v54 = vand.u32 4294901760, %v4846_v11 }
 0x1ff   :  { %v5006_v4 = vpack.c.bf16 %v5412_v17, %v5411_v0  ;;  %2074 = vmatmul.mubr.f32.vlgmr.msra.gmra.mrb[32].mxu1 %v5413_v8  ;;  %v2294_v6 = vand.u32 4294901760, %v2293_v33  ;;  %v5417_v42 = vand.u32 4294901760, %v4838_v32  ;;  %v1961_v0 = vld [vmem:[%s5203_s3] sm:$0xff]  ;;  %v5419_v15 = vand.u32 4294901760, %v4705_v29  ;;  %s3934_s3 = smov [#allocation2]  }
 0x200   :  { %v5014_v59 = vpack.c.bf16 %v5415_v37, %v5414_v60  ;;  %3587 = vmatpush3.bf16.msra.mxu1 %v4734_v58  ;;  %2304 = vmatprep.mubr.f32.mxu1 %v4656_v62  ;;  %v5420_v33 = vand.u32 4294901760, %v4697_v47  ;;  %v5422_v8 = vand.u32 4294901760, %v4866_v28  ;;  %v5423_v60 = vand.u32 4294901760, %v4858_v49  ;;  %s2836_s30 = sshll.u32 %s3934_s3, 4  ;;  %s2837_s30 = int_to_ptr.vmem [resolvable:$true] %s2836_s30 }
 0x201   :  { %v5020_v25 = vpack.c.bf16 %v5417_v42, %v5416_v54  ;;  %v5425_v54 = vand.u32 4294901760, %v4723_v53  ;;  %v5426_v42 = vand.u32 4294901760, %v4714_v40  ;;  %3589 = vmatprep.subr.bf16.mxu1 %v4895_v2  ;;  %v3612_v58 = vpack.c.bf16 %v2301_v30, %v2294_v6  ;;  %s3909_s5 = scalar_lea.vmem %s2837_s30, 128  ;;  %p3914_p1 = scmp.lt.s32.totalorder %s2837_s30, %s2837_s30 }
 0x202   :  { %v5031_v17 = vpack.c.bf16 %v5420_v33, %v5419_v15  ;;  %v5037_v37 = vpack.c.bf16 %v5423_v60, %v5422_v8  ;;  %v3933_v62 = vmov 0   ;;  %v5427_v15 = vand.u32 4294901760, %v4886_v27  ;;  %p3910_p0 = scmp.ne.s32.totalorder %s2837_s30, %s3909_s5  ;;  %p3915_p2 = scmp.lt.s32.totalorder %s3909_s5, %s3909_s5 }
 0x203   :  { %5418 = vst [vmem:[#allocation31_spill] sm:$0xff] %v5020_v25  ;;  %v5043_v25 = vpack.c.bf16 %v5426_v42, %v5425_v54  ;;  %3908 = vset.pattern.permute.xlu0 %v3933_v62  ;;  %v5428_v33 = vand.u32 4294901760, %v4880_v5  ;;  %v5429_v8 = vand.u32 4294901760, %v4741_v24  ;;  %v5430_v60 = vand.u32 4294901760, %v4732_v13 }
 0x204   :  { %5421 = vst [vmem:[#allocation32_spill] sm:$0xff] %v5031_v17  ;;  %5424 = vst [vmem:[#allocation33_spill] sm:$0xff] %v5037_v37  ;;  %1964 = vperm.xlu0 %3908, %v1961_v0   ;;  %v5431_v54 = vand.u32 4294901760, %v4906_v7  ;;  %v5432_v2 = vand.u32 4294901760, %v4900_v50  ;;  %v5433_v62 = vand.u32 4294901760, %v4759_v18  ;;  %v5434_v6 = vand.u32 4294901760, %v4750_v36  ;;  %3591 = vmatpush3.bf16.msra.mxu1 %v4752_v46  ;;  %p3916_p3 = por %p3915_p2, %p3914_p1 }
 0x205   :  { %v5050_v17 = vpack.c.bf16 %v5428_v33, %v5427_v15  ;;  %v5056_v37 = vpack.c.bf16 %v5430_v60, %v5429_v8  ;;  %v5435_v15 = vand.u32 4294901760, %v4926_v55  ;;  %v5436_v24 = vand.u32 4294901760, %v4920_v1  ;;  %3593 = vmatprep.subr.bf16.mxu1 %v4915_v41  ;;  %v5448_v46 = vld [vmem:[#allocation24_spill] sm:$0xff] }
 0x206   :  { %v5062_v30 = vpack.c.bf16 %v5432_v2, %v5431_v54  ;;  %v5068_v42 = vpack.c.bf16 %v5434_v6, %v5433_v62  ;;  %v5437_v0 = vand.u32 4294901760, %v4777_v12  ;;  %v5438_v7 = vand.u32 4294901760, %v4768_v34  ;;  %v5443_v34 = vld [vmem:[#allocation10_spill] sm:$0xff]  ;;  %v5444_v12 = vld [vmem:[#allocation12_spill] sm:$0xff]  ;;  %p3917_p4 = pnand %p3916_p3, %p3910_p0 }
 0x207   :  { %v5074_v13 = vpack.c.bf16 %v5436_v24, %v5435_v15  ;;  %v5082_v50 = vpack.c.bf16 %v2285_v10, %v2278_v38  ;;  %v5439_v18 = vand.u32 4294901760, %v4795_v19  ;;  %v5440_v36 = vand.u32 4294901760, %v4786_v56  ;;  %v5445_v56 = vld [vmem:[#allocation14_spill] sm:$0xff]  ;;  %v5446_v19 = vld [vmem:[#allocation20_spill] sm:$0xff] }
 0x208   :  { %v5080_v33 = vpack.c.bf16 %v5438_v7, %v5437_v0  ;;  %v5090_v60 = vpack.c.bf16 %v2299_v45, %v2292_v20  ;;  %v5441_v1 = vand.u32 4294901760, %v4813_v44  ;;  %v5442_v55 = vand.u32 4294901760, %v4804_v31  ;;  %3595 = vmatpush3.bf16.msra.mxu1 %v5443_v34  ;;  %v5447_v31 = vld [vmem:[#allocation22_spill] sm:$0xff]  ;;  %v5452_v10 = vld [vmem:[#allocation16_spill] sm:$0xff]  ;;  %v5473_v20 = vld [vmem:[#allocation13_spill] sm:$0xff] }
 0x209   :  { %v5088_v8 = vpack.c.bf16 %v5440_v36, %v5439_v18  ;;  %3597 = vmatprep.subr.bf16.mxu1 %v4935_v52  ;;  %v5449_v41 = vpack.c.bf16 %v4822_v23, %v4829_v9  ;;  %v5450_v52 = vld [vmem:[#allocation17_spill] sm:$0xff]  ;;  %v5451_v44 = vpack.c.bf16 %v4677_v61, %v4686_v26  ;;  %v5454_v38 = vpack.c.bf16 %v4697_v47, %v4705_v29  ;;  %v5459_v47 = vld [vmem:[#allocation18_spill] sm:$0xff] }
 0x20a   :  { %v5096_v54 = vpack.c.bf16 %v5442_v55, %v5441_v1  ;;  %v5455_v23 = vpack.c.bf16 %v4858_v49, %v4866_v28  ;;  %v5456_v9 = vpack.c.bf16 %v4714_v40, %v4723_v53  ;;  %v5457_v61 = vpack.c.bf16 %v4880_v5, %v4886_v27  ;;  %v5458_v26 = vld [vmem:[#allocation21_spill] sm:$0xff]  ;;  %v5462_v53 = vld [vmem:[#allocation23_spill] sm:$0xff]  ;;  %v5470_v27 = vld [vmem:[#allocation28_spill] sm:$0xff] }
 0x20b   :  { %v5460_v29 = vld [vmem:[#allocation5_spill] sm:$0xff]  ;;  %v5461_v40 = vand.u32 4294901760, %v5452_v10  ;;  %v5465_v49 = vld [vmem:[#allocation7_spill] sm:$0xff]  ;;  %v5476_v45 = vand.u32 4294901760, %v5459_v47 }
 0x20c   :  { %3599 = vmatpush3.bf16.msra.mxu1 %v5444_v12  ;;  %v5468_v28 = vld [vmem:[#allocation27_spill] sm:$0xff]  ;;  %v5469_v5 = vld [vmem:[#allocation9_spill] sm:$0xff] }
 0x20d   :  { %3601 = vmatprep.subr.bf16.mxu1 %v4954_v57  ;;  %v5453_v57 = vpack.c.bf16 %v4838_v32, %v4846_v11  ;;  %v5463_v32 = vld [vmem:[#allocation6_spill] sm:$0xff]  ;;  %v5464_v11 = vld [vmem:[#allocation25_spill] sm:$0xff] }
 0x210   :  { %3603 = vmatpush3.bf16.msra.mxu1 %v5445_v56 }
 0x211   :  { %3605 = vmatprep.subr.bf16.mxu1 %v3604_v48  ;;  %v5475_v48 = vld [vmem:[#allocation19_spill] sm:$0xff] }
 0x214   :  { %3607 = vmatpush3.bf16.msra.mxu1 %v5446_v19 }
 0x215   :  { %3609 = vmatprep.subr.bf16.mxu1 %v3608_v16 }
 0x218   :  { %3611 = vmatpush3.bf16.msra.mxu1 %v5447_v31 }
 0x219   :  { %3613 = vmatprep.subr.bf16.mxu1 %v3612_v58 }
 0x21c   :  { %3615 = vmatpush3.bf16.msra.mxu1 %v5448_v46 }
 0x21d   :  { %3617 = vmatprep.subr.bf16.mxu1 %v5449_v41 }
 0x21f   :  { %2306 = vmatmul.mubr.f32.vlgmr.msra.gmra.mrb[34].mxu1 %v5450_v52 }
 0x220   :  { %3619 = vmatpush3.bf16.msra.mxu1 %v5451_v44  ;;  %2441 = vmatprep.mubr.f32.mxu1 %v5452_v10 }
 0x221   :  { %3621 = vmatprep.subr.bf16.mxu1 %v5453_v57 }
 0x224   :  { %3623 = vmatpush3.bf16.msra.mxu1 %v5454_v38 }
 0x225   :  { %3625 = vmatprep.subr.bf16.mxu1 %v5455_v23 }
 0x228   :  { %3627 = vmatpush3.bf16.msra.mxu1 %v5456_v9 }
 0x229   :  { %3629 = vmatprep.subr.bf16.mxu1 %v5457_v61 }
 0x22c   :  { %3631 = vmatpush3.bf16.msra.mxu1 %v3630_v51  ;;  %v5477_v51 = vld [vmem:[#allocation15_spill] sm:$0xff] }
 0x22d   :  { %3633 = vmatprep.subr.bf16.mxu1 %v3632_v3  ;;  %v5478_v3 = vld [vmem:[#allocation31_spill] sm:$0xff] }
 0x230   :  { %3635 = vmatpush3.bf16.msra.mxu1 %v3634_v43  ;;  %v5479_v43 = vld [vmem:[#allocation32_spill] sm:$0xff] }
 0x231   :  { %3637 = vmatprep.subr.bf16.mxu1 %v3636_v63  ;;  %v5480_v63 = vld [vmem:[#allocation33_spill] sm:$0xff] }
 0x234   :  { %3639 = vmatpush3.bf16.msra.mxu1 %v3638_v21  ;;  %v5472_v21 = vld [vmem:[#allocation29_spill] sm:$0xff] }
 0x235   :  { %3641 = vmatprep.subr.bf16.mxu1 %v3640_v39  ;;  %v5474_v39 = vld [vmem:[#allocation30_spill] sm:$0xff] }
 0x238   :  { %3643 = vmatpush3.bf16.msra.mxu1 %v3642_v14  ;;  %v5466_v14 = vld [vmem:[#allocation26_spill] sm:$0xff] }
 0x239   :  { %3645 = vmatprep.subr.bf16.mxu1 %v3644_v35  ;;  %v5471_v35 = vld [vmem:[#allocation11_spill] sm:$0xff] }
 0x23c   :  { %3647 = vmatpush3.bf16.msra.mxu1 %v3646_v22  ;;  %v5467_v22 = vld [vmem:[#allocation8_spill] sm:$0xff] }
 0x23d   :  { %3649 = vmatprep.subr.bf16.mxu1 %v5458_v26 }
 0x23f   :  { %2444 = vmatmul.mubr.f32.vlgmr.msra.gmra.mrb[36].mxu1 %v5459_v47 }
 0x240   :  { %3651 = vmatpush3.bf16.msra.mxu1 %v5460_v29  ;;  %2548 = vmatprep.mubr.f32.mxu1 %v5461_v40 }
 0x241   :  { %3653 = vmatprep.subr.bf16.mxu1 %v5462_v53 }
 0x244   :  { %3655 = vmatpush3.bf16.msra.mxu1 %v5463_v32 }
 0x245   :  { %3657 = vmatprep.subr.bf16.mxu1 %v5464_v11 }
 0x248   :  { %3659 = vmatpush3.bf16.msra.mxu1 %v5465_v49 }
 0x249   :  { %3661 = vmatprep.subr.bf16.mxu1 %v5466_v14 }
 0x24c   :  { %3663 = vmatpush3.bf16.msra.mxu1 %v5467_v22 }
 0x24d   :  { %3665 = vmatprep.subr.bf16.mxu1 %v5468_v28 }
 0x250   :  { %3667 = vmatpush3.bf16.msra.mxu1 %v5469_v5 }
 0x251   :  { %3669 = vmatprep.subr.bf16.mxu1 %v5470_v27 }
 0x254   :  { %3671 = vmatpush3.bf16.msra.mxu1 %v5471_v35 }
 0x255   :  { %3673 = vmatprep.subr.bf16.mxu1 %v5472_v21 }
 0x258   :  { %3675 = vmatpush3.bf16.msra.mxu1 %v5473_v20 }
 0x259   :  { %3677 = vmatprep.subr.bf16.mxu1 %v5474_v39 }
 0x25c   :  { %3679 = vmatpush3.bf16.msra.mxu1 %v5475_v48 }
 0x25d   :  { %3681 = vmatprep.subr.bf16.mxu1 %v5006_v4 }
 0x25f   :  { %2552 = vmatmul.mubr.f32.vlgmr.msra.gmra.mrb[38].mxu1 %v5476_v45 }
 0x260   :  { %3683 = vmatpush3.bf16.msra.mxu1 %v5014_v59  ;;  %2718 = vmatprep.mubr.f32.mxu1 %v5477_v51 }
 0x261   :  { %3685 = vmatprep.subr.bf16.mxu1 %v5478_v3 }
 0x264   :  { %3687 = vmatpush3.bf16.msra.mxu1 %v5479_v43 }
 0x265   :  { %3689 = vmatprep.subr.bf16.mxu1 %v5480_v63 }
 0x268   :  { %3691 = vmatpush3.bf16.msra.mxu1 %v5043_v25 }
 0x269   :  { %3693 = vmatprep.subr.bf16.mxu1 %v5050_v17 }
 0x26c   :  { %3695 = vmatpush3.bf16.msra.mxu1 %v5056_v37 }
 0x26d   :  { %3697 = vmatprep.subr.bf16.mxu1 %v5062_v30 }
 0x270   :  { %3699 = vmatpush3.bf16.msra.mxu1 %v5068_v42 }
 0x271   :  { %3701 = vmatprep.subr.bf16.mxu1 %v5074_v13 }
 0x274   :  { %3703 = vmatpush3.bf16.msra.mxu1 %v5080_v33 }
 0x275   :  { %3705 = vmatprep.subr.bf16.mxu1 %v5082_v50 }
 0x278   :  { %3707 = vmatpush3.bf16.msra.mxu1 %v5088_v8 }
 0x279   :  { %3709 = vmatprep.subr.bf16.mxu1 %v5090_v60 }
 0x27c   :  { %3711 = vmatpush3.bf16.msra.mxu1 %v5096_v54 }
 0x27d   :  { %3713 = vmatprep.subr.bf16.mxu1 %v5458_v26 }
 0x27f   :  { %2720 = vmatmul.mubr.f32.vlgmr.msra.gmra.mrb[40].mxu1 %v5450_v52 }
 0x280   :  { %3715 = vmatpush3.bf16.msra.mxu1 %v5460_v29  ;;  %2822 = vmatprep.mubr.f32.mxu1 %v5477_v51 }
 0x281   :  { %3717 = vmatprep.subr.bf16.mxu1 %v5462_v53 }
 0x283   :  { %v1965_v4 = vpop.permute.xlu0 %1964 }
 0x284   :  { %3719 = vmatpush3.bf16.msra.mxu1 %v5463_v32 }
 0x285   :  { %3721 = vmatprep.subr.bf16.mxu1 %v5464_v11 }
 0x288   :  { %3723 = vmatpush3.bf16.msra.mxu1 %v5465_v49 }
 0x289   :  { %3725 = vmatprep.subr.bf16.mxu1 %v5466_v14 }
 0x28c   :  { %3727 = vmatpush3.bf16.msra.mxu1 %v5467_v22 }
 0x28d   :  { %3729 = vmatprep.subr.bf16.mxu1 %v5468_v28 }
 0x290   :  { %3731 = vmatpush3.bf16.msra.mxu1 %v5469_v5 }
 0x291   :  { %3733 = vmatprep.subr.bf16.mxu1 %v5470_v27 }
 0x294   :  { %3735 = vmatpush3.bf16.msra.mxu1 %v5471_v35 }
 0x295   :  { %3737 = vmatprep.subr.bf16.mxu1 %v5472_v21 }
 0x298   :  { %3739 = vmatpush3.bf16.msra.mxu1 %v5473_v20 }
 0x299   :  { %3741 = vmatprep.subr.bf16.mxu1 %v5474_v39 }
 0x29c   :  { %3743 = vmatpush3.bf16.msra.mxu1 %v5475_v48 }
 0x29f   :  { %2824 = vmatmul.mubr.f32.vlgmr.msra.gmra.mrb[42].mxu1 %v5450_v52 }
 0x2d2   :  { %v3074_v25 = vpop.f32.mrb[32].mxu1 }
 0x2d3   :  { %v3075_v59 = vpop.f32.mrb[33].mxu1 }
 0x2d4   :  { %v3076_v16 = vadd.f32 %v3075_v59, %v3074_v25 }
 0x2d6   :  { %v2076_v58 = vadd.f32 %v3076_v16, %v1965_v4 }
 0x2f2   :  { %v3109_v17 = vpop.f32.mrb[34].mxu1 }
 0x2f3   :  { %v3110_v37 = vpop.f32.mrb[35].mxu1 }
 0x2f4   :  { %v3111_v2 = vadd.f32 %v3110_v37, %v3109_v17 }
 0x2f6   :  { %v2308_v30 = vadd.f32 %v3111_v2, %v2076_v58 }
 0x312   :  { %v3144_v62 = vpop.f32.mrb[36].mxu1 }
 0x313   :  { %v3145_v6 = vpop.f32.mrb[37].mxu1 }
 0x314   :  { %v3146_v42 = vadd.f32 %v3145_v6, %v3144_v62 }
 0x316   :  { %v2446_v15 = vadd.f32 %v3146_v42, %v2308_v30 }
 0x332   :  { %v3179_v24 = vpop.f32.mrb[38].mxu1 }
 0x333   :  { %v3180_v13 = vpop.f32.mrb[39].mxu1 }
 0x334   :  { %v3181_v0 = vadd.f32 %v3180_v13, %v3179_v24 }
 0x336   :  { %v2554_v7 = vadd.f32 %v3181_v0, %v2446_v15 }
 0x352   :  { %v3214_v33 = vpop.f32.mrb[40].mxu1 }
 0x353   :  { %v3215_v50 = vpop.f32.mrb[41].mxu1 }
 0x354   :  { %v3216_v18 = vadd.f32 %v3215_v50, %v3214_v33 }
 0x356   :  { %v2722_v36 = vadd.f32 %v3216_v18, %v2554_v7 }
 0x372   :  { %v3249_v8 = vpop.f32.mrb[42].mxu1 }
 0x373   :  { %v3250_v60 = vpop.f32.mrb[43].mxu1 }
 0x374   :  { %v3251_v1 = vadd.f32 %v3250_v60, %v3249_v8 }
 0x376   :  { %v2826_v55 = vadd.f32 %v3251_v1, %v2722_v36 }
 0x378   :  { %2829 = vst [vmem:[#allocation2] sm:$0xff] %v2826_v55 }
 0x379   :  { %3920 = shalt.err (!%p3917_p4)
}
 0x37a   :  { %s3921_s8 = scalar_lea.hbm %s5204_s4, 128 }
 0x37b   :  { %p3922_p5 = scmp.ne.s32.totalorder %s5204_s4, %s3921_s8  ;;  %p3925_p6 = scmp.lt.u32.totalorder %s3921_s8, %s5204_s4 }
 0x37d   :  { %p3927_p7 = pnand %p3925_p6, %p3922_p5 }
 0x37f   :  { %3930 = shalt.err (!%p3927_p7)
}
 0x380   :  { %2839 = dma.vmem_to_hbm [thread:$0]  %s2837_s30, 128, %s5204_s4, [#allocation3]  }
 0x381   :  { %3931 = dma.done.wait [#allocation3], 128  }
 0x382   :  { %3932 = vsyncadd [#allocation3], 4294967168 }
 0x383   :  { %2843 = vsyncpa [#allocation3], 1 }

</bundles_post_ra>
